<compile_context>
chip_gen: v5e
topology: v5e:2x2
jax: 0.10.0
libtpu: 0.0.40
codegen_flags: <defaults>
</compile_context>

<pallas_src>
import jax
import jax.numpy as jnp
import numpy as np
from jax.experimental import pallas as pl
from jax.experimental.pallas import tpu as pltpu

NUM_ADAPTERS = 2  # static number of LoRA adapters in the batch


def _row_linear_lora_kernel(idx_ref, lane_ref, x_ref, wt_ref, b_ref,
                            la_ref, lb_ref, out_ref, acc_ref, v_ref):
    # idx_ref  : (tm, 1)    int32  per-token adapter index
    # lane_ref : (1, A*R)   int32  adapter id owning each packed-rank lane
    # x_ref    : (tm, tk)   bf16   input tokens (K block)
    # wt_ref   : (tk, tn)   bf16   base weight, pre-transposed (K block, N tile)
    # b_ref    : (1, tn)    f32    base bias
    # la_ref   : (tk, A*R)  bf16   packed lora_a for this layer (K block)
    # lb_ref   : (A*R, tn)  bf16   packed lora_b for this layer (N tile)
    # acc_ref  : (tm, tn)   f32    base-matmul accumulator (scratch)
    # v_ref    : (tm, A*R)  f32    masked LoRA shrink intermediate (scratch)
    j = pl.program_id(1)
    k = pl.program_id(2)
    nk = pl.num_programs(2)

    @pl.when(k == 0)
    def _():
        acc_ref[...] = jnp.zeros_like(acc_ref)

    x = x_ref[...]

    # Base layer partial product for this K block.
    acc_ref[...] += jnp.dot(x, wt_ref[...], preferred_element_type=jnp.float32)

    # LoRA shrink (x @ LA) depends only on (i, k): compute once per row tile.
    @pl.when(j == 0)
    def _():
        @pl.when(k == 0)
        def _():
            v_ref[...] = jnp.zeros_like(v_ref)

        v_ref[...] += jnp.dot(x, la_ref[...], preferred_element_type=jnp.float32)

        # Fold the per-token adapter mask into the tiny rank-R intermediate.
        @pl.when(k == nk - 1)
        def _():
            mask = (idx_ref[...] == lane_ref[...]).astype(jnp.float32)  # (tm, A*R)
            v_ref[...] *= mask

    # Finalize tile: bias + fused LoRA expand, single output write.
    @pl.when(k == nk - 1)
    def _():
        acc = acc_ref[...] + b_ref[...]
        acc += jnp.dot(v_ref[...].astype(lb_ref.dtype), lb_ref[...],
                       preferred_element_type=jnp.float32)
        out_ref[...] = acc.astype(out_ref.dtype)


def tensor_parallel_adapter_row_linear(x, weight_t, bias, lora_a_layer, lora_b_layer,
                                       adapter_indices, *, tm=128, tn=256, tk=512,
                                       compute_dtype=jnp.bfloat16):
    """x: (M, K); weight_t: (K, N) base weight PRE-TRANSPOSED (do the transpose
    once and cache it, not per call); bias: (N,); lora_a_layer: (A, K, R);
    lora_b_layer: (A, R, N); adapter_indices: (M,) int (== A means no adapter)."""
    M, K = x.shape
    Kw, N = weight_t.shape
    A, Ka, R = lora_a_layer.shape
    assert Kw == K and Ka == K and A == NUM_ADAPTERS
    AR = A * R

    # Clamp tiles to the problem size (small demo shapes) and check divisibility.
    tm = M if M < tm else tm
    tn = N if N < tn else tn
    tk = K if K < tk else tk
    assert M % tm == 0 and N % tn == 0 and K % tk == 0

    # Pack operands: LA -> (K, A*R), LB -> (A*R, N); cast matmul operands to bf16.
    la_packed = jnp.transpose(lora_a_layer, (1, 0, 2)).reshape(K, AR).astype(compute_dtype)
    lb_packed = lora_b_layer.reshape(AR, N).astype(compute_dtype)
    x_c = x.astype(compute_dtype)
    wt_c = weight_t.astype(compute_dtype)
    b2 = bias.reshape(1, N).astype(jnp.float32)
    idx2 = adapter_indices.reshape(M, 1).astype(jnp.int32)
    lane_ids = jnp.repeat(jnp.arange(A, dtype=jnp.int32), R).reshape(1, AR)

    grid = (M // tm, N // tn, K // tk)
    return pl.pallas_call(
        _row_linear_lora_kernel,
        out_shape=jax.ShapeDtypeStruct((M, N), x.dtype),
        grid_spec=pltpu.PrefetchScalarGridSpec(
            num_scalar_prefetch=0,
            grid=grid,
            in_specs=[
                pl.BlockSpec((tm, 1), lambda i, j, k: (i, 0)),      # adapter ids
                pl.BlockSpec((1, AR), lambda i, j, k: (0, 0)),      # lane -> adapter id
                pl.BlockSpec((tm, tk), lambda i, j, k: (i, k)),     # x tile
                pl.BlockSpec((tk, tn), lambda i, j, k: (k, j)),     # W^T tile
                pl.BlockSpec((1, tn), lambda i, j, k: (0, j)),      # bias tile
                pl.BlockSpec((tk, AR), lambda i, j, k: (k, 0)),     # packed lora_a
                pl.BlockSpec((AR, tn), lambda i, j, k: (0, j)),     # packed lora_b
            ],
            out_specs=pl.BlockSpec((tm, tn), lambda i, j, k: (i, j)),
            scratch_shapes=[
                pltpu.VMEM((tm, tn), jnp.float32),   # base accumulator
                pltpu.VMEM((tm, AR), jnp.float32),   # masked LoRA shrink
            ],
        ),
        compiler_params=pltpu.CompilerParams(
            dimension_semantics=("parallel", "arbitrary", "arbitrary"),
            vmem_limit_bytes=48 * 1024 * 1024),
    )(idx2, lane_ids, x_c, wt_c, b2, la_packed, lb_packed)


if __name__ == "__main__":
    # Small, deterministic synthetic setup.
    M, K, N, R = 256, 256, 512, 16       # tokens, hidden_in, hidden_out, lora rank
    num_layers, layer_id = 3, 1

    key = jax.random.PRNGKey(0)
    ks = jax.random.split(key, 6)
    x = jax.random.normal(ks[0], (M, K), jnp.float32)
    weight = jax.random.normal(ks[1], (N, K), jnp.float32) * 0.05
    bias = jax.random.normal(ks[2], (N,), jnp.float32)
    # Full per-adapter LoRA stacks [adapter, layer, ...]; layer_id selected below (glue).
    lora_a = jax.random.normal(ks[3], (NUM_ADAPTERS, num_layers, K, R), jnp.float32) * 0.05
    lora_b = jax.random.normal(ks[4], (NUM_ADAPTERS, num_layers, R, N), jnp.float32) * 0.05
    # Per-token adapter index; value == NUM_ADAPTERS means "no adapter" (mask -> 0).
    adapter_indices = jax.random.randint(ks[5], (M,), 0, NUM_ADAPTERS + 1)

    la_layer = lora_a[:, layer_id]        # (A, K, R), already oriented for x @ lora_a
    lb_layer = lora_b[:, layer_id]        # (A, R, N)

    # Transpose once, outside the per-call path (would be cached in a real model).
    weight_t = weight.T                   # (K, N)

    out = tensor_parallel_adapter_row_linear(x, weight_t, bias, la_layer, lb_layer,
                                             adapter_indices)
    out = jax.block_until_ready(out)

    # Pure-JAX f32 reference of the PyTorch forward semantics.
    ref = x @ weight.T + bias
    for a in range(NUM_ADAPTERS):
        mask = (adapter_indices == a).astype(jnp.float32)[:, None]
        ref = ref + ((x @ la_layer[a]) @ lb_layer[a]) * mask
    # bf16 matmul operands -> loose tolerance vs f32 reference.
    np.testing.assert_allclose(np.asarray(out), np.asarray(ref), rtol=3e-2, atol=3e-2)

    print("KERNEL_OK")
</pallas_src>

<mosaic_0001>
module attributes {stable_mosaic.version = 11 : i64} {
  func.func @_row_linear_lora_kernel(%arg0: i32, %arg1: i32, %arg2: i32, %arg3: memref<128x1xi32, #tpu.memory_space<vmem>>, %arg4: memref<1x32xi32, #tpu.memory_space<vmem>>, %arg5: memref<128x256xbf16, #tpu.memory_space<vmem>>, %arg6: memref<256x256xbf16, #tpu.memory_space<vmem>>, %arg7: memref<1x256xf32, #tpu.memory_space<vmem>>, %arg8: memref<256x32xbf16, #tpu.memory_space<vmem>>, %arg9: memref<32x256xbf16, #tpu.memory_space<vmem>>, %arg10: memref<128x256xf32, #tpu.memory_space<vmem>>, %arg11: memref<128x256xf32, #tpu.memory_space<vmem>>, %arg12: memref<128x32xf32, #tpu.memory_space<vmem>>) attributes {dimension_semantics = [#tpu.dimension_semantics<parallel>, #tpu.dimension_semantics<arbitrary>, #tpu.dimension_semantics<arbitrary>], iteration_bounds = array<i64: 2, 2, 1>, scalar_prefetch = 0 : i64, scratch_operands = 2 : i64, tpu.core_type = #tpu.core_type<tc>, window_params = [{transform_indices = @transform_0, window_bounds = array<i64: 128, 1>}, {pipeline_mode = #tpu.pipeline_mode<synchronous>, transform_indices = @transform_1, window_bounds = array<i64: 1, 32>}, {transform_indices = @transform_2, window_bounds = array<i64: 128, 256>}, {transform_indices = @transform_3, window_bounds = array<i64: 256, 256>}, {transform_indices = @transform_4, window_bounds = array<i64: 1, 256>}, {transform_indices = @transform_5, window_bounds = array<i64: 256, 32>}, {transform_indices = @transform_6, window_bounds = array<i64: 32, 256>}, {transform_indices = @transform_7, window_bounds = array<i64: 128, 256>}]} {
    %c0_i32 = arith.constant 0 : i32
    %0 = arith.cmpi eq, %arg2, %c0_i32 : i32
    %1 = arith.extui %0 : i1 to i32
    %c0_i32_0 = arith.constant 0 : i32
    %2 = arith.cmpi ne, %1, %c0_i32_0 : i32
    scf.if %2 {
      %cst_12 = arith.constant 0.000000e+00 : f32
      %15 = vector.broadcast %cst_12 : f32 to vector<128x256xf32>
      %c0_13 = arith.constant 0 : index
      %c0_14 = arith.constant 0 : index
      %16 = vector.load %arg11[%c0_13, %c0_14] : memref<128x256xf32, #tpu.memory_space<vmem>>, vector<128x256xf32>
      tpu.vector_store %arg11[%c0_13, %c0_14], %15 {strides = array<i32>} : memref<128x256xf32, #tpu.memory_space<vmem>>, vector<128x256xf32>,
    } else {
    }
    %c0 = arith.constant 0 : index
    %c0_1 = arith.constant 0 : index
    %3 = vector.load %arg5[%c0, %c0_1] : memref<128x256xbf16, #tpu.memory_space<vmem>>, vector<128x256xbf16>
    %c0_2 = arith.constant 0 : index
    %c0_3 = arith.constant 0 : index
    %4 = vector.load %arg11[%c0_2, %c0_3] : memref<128x256xf32, #tpu.memory_space<vmem>>, vector<128x256xf32>
    %c0_4 = arith.constant 0 : index
    %c0_5 = arith.constant 0 : index
    %5 = vector.load %arg6[%c0_4, %c0_5] : memref<256x256xbf16, #tpu.memory_space<vmem>>, vector<256x256xbf16>
    %cst = arith.constant dense<0.000000e+00> : vector<128x256xf32>
    %6 = tpu.matmul %3, %5, %cst {dimension_numbers = #tpu.dot_dimension_numbers<[1], [0], [0], [1], [0, 0, 1, 1], [], []>} : vector<128x256xbf16>, vector<256x256xbf16>, vector<128x256xf32> -> vector<128x256xf32>
    %7 = arith.addf %4, %6 : vector<128x256xf32>
    %c0_6 = arith.constant 0 : index
    %c0_7 = arith.constant 0 : index
    %8 = vector.load %arg11[%c0_6, %c0_7] : memref<128x256xf32, #tpu.memory_space<vmem>>, vector<128x256xf32>
    tpu.vector_store %arg11[%c0_6, %c0_7], %7 {strides = array<i32>} : memref<128x256xf32, #tpu.memory_space<vmem>>, vector<128x256xf32>,
    %c0_i32_8 = arith.constant 0 : i32
    %9 = arith.cmpi eq, %arg1, %c0_i32_8 : i32
    %10 = arith.extui %9 : i1 to i32
    %c0_i32_9 = arith.constant 0 : i32
    %11 = arith.cmpi ne, %10, %c0_i32_9 : i32
    scf.if %11 {
      %c0_i32_12 = arith.constant 0 : i32
      %15 = arith.cmpi eq, %arg2, %c0_i32_12 : i32
      %16 = arith.extui %15 : i1 to i32
      %c0_i32_13 = arith.constant 0 : i32
      %17 = arith.cmpi ne, %16, %c0_i32_13 : i32
      scf.if %17 {
        %cst_23 = arith.constant 0.000000e+00 : f32
        %26 = vector.broadcast %cst_23 : f32 to vector<128x32xf32>
        %c0_24 = arith.constant 0 : index
        %c0_25 = arith.constant 0 : index
        %27 = vector.load %arg12[%c0_24, %c0_25] : memref<128x32xf32, #tpu.memory_space<vmem>>, vector<128x32xf32>
        tpu.vector_store %arg12[%c0_24, %c0_25], %26 {strides = array<i32>} : memref<128x32xf32, #tpu.memory_space<vmem>>, vector<128x32xf32>,
      } else {
      }
      %c0_14 = arith.constant 0 : index
      %c0_15 = arith.constant 0 : index
      %18 = vector.load %arg12[%c0_14, %c0_15] : memref<128x32xf32, #tpu.memory_space<vmem>>, vector<128x32xf32>
      %c0_16 = arith.constant 0 : index
      %c0_17 = arith.constant 0 : index
      %19 = vector.load %arg8[%c0_16, %c0_17] : memref<256x32xbf16, #tpu.memory_space<vmem>>, vector<256x32xbf16>
      %cst_18 = arith.constant dense<0.000000e+00> : vector<128x32xf32>
      %20 = tpu.matmul %3, %19, %cst_18 {dimension_numbers = #tpu.dot_dimension_numbers<[1], [0], [0], [1], [0, 0, 1, 1], [], []>} : vector<128x256xbf16>, vector<256x32xbf16>, vector<128x32xf32> -> vector<128x32xf32>
      %21 = arith.addf %18, %20 : vector<128x32xf32>
      %c0_19 = arith.constant 0 : index
      %c0_20 = arith.constant 0 : index
      %22 = vector.load %arg12[%c0_19, %c0_20] : memref<128x32xf32, #tpu.memory_space<vmem>>, vector<128x32xf32>
      tpu.vector_store %arg12[%c0_19, %c0_20], %21 {strides = array<i32>} : memref<128x32xf32, #tpu.memory_space<vmem>>, vector<128x32xf32>,
      %c0_i32_21 = arith.constant 0 : i32
      %23 = arith.cmpi eq, %arg2, %c0_i32_21 : i32
      %24 = arith.extui %23 : i1 to i32
      %c0_i32_22 = arith.constant 0 : i32
      %25 = arith.cmpi ne, %24, %c0_i32_22 : i32
      scf.if %25 {
        %c0_23 = arith.constant 0 : index
        %c0_24 = arith.constant 0 : index
        %26 = vector.load %arg3[%c0_23, %c0_24] : memref<128x1xi32, #tpu.memory_space<vmem>>, vector<128x1xi32>
        %c0_25 = arith.constant 0 : index
        %c0_26 = arith.constant 0 : index
        %27 = vector.load %arg4[%c0_25, %c0_26] : memref<1x32xi32, #tpu.memory_space<vmem>>, vector<1x32xi32>
        %28 = vector.broadcast %26 : vector<128x1xi32> to vector<128x32xi32>
        %29 = vector.broadcast %27 : vector<1x32xi32> to vector<128x32xi32>
        %30 = arith.cmpi eq, %28, %29 : vector<128x32xi32>
        %31 = arith.extui %30 : vector<128x32xi1> to vector<128x32xi32>
        %32 = arith.sitofp %31 : vector<128x32xi32> to vector<128x32xf32>
        %c0_27 = arith.constant 0 : index
        %c0_28 = arith.constant 0 : index
        %33 = vector.load %arg12[%c0_27, %c0_28] : memref<128x32xf32, #tpu.memory_space<vmem>>, vector<128x32xf32>
        %34 = arith.mulf %33, %32 : vector<128x32xf32>
        %c0_29 = arith.constant 0 : index
        %c0_30 = arith.constant 0 : index
        %35 = vector.load %arg12[%c0_29, %c0_30] : memref<128x32xf32, #tpu.memory_space<vmem>>, vector<128x32xf32>
        tpu.vector_store %arg12[%c0_29, %c0_30], %34 {strides = array<i32>} : memref<128x32xf32, #tpu.memory_space<vmem>>, vector<128x32xf32>,
      } else {
      }
    } else {
    }
    %c0_i32_10 = arith.constant 0 : i32
    %12 = arith.cmpi eq, %arg2, %c0_i32_10 : i32
    %13 = arith.extui %12 : i1 to i32
    %c0_i32_11 = arith.constant 0 : i32
    %14 = arith.cmpi ne, %13, %c0_i32_11 : i32
    scf.if %14 {
      %c0_12 = arith.constant 0 : index
      %c0_13 = arith.constant 0 : index
      %15 = vector.load %arg11[%c0_12, %c0_13] : memref<128x256xf32, #tpu.memory_space<vmem>>, vector<128x256xf32>
      %c0_14 = arith.constant 0 : index
      %c0_15 = arith.constant 0 : index
      %16 = vector.load %arg7[%c0_14, %c0_15] : memref<1x256xf32, #tpu.memory_space<vmem>>, vector<1x256xf32>
      %17 = vector.broadcast %16 : vector<1x256xf32> to vector<128x256xf32>
      %18 = arith.addf %15, %17 : vector<128x256xf32>
      %c0_16 = arith.constant 0 : index
      %c0_17 = arith.constant 0 : index
      %19 = vector.load %arg12[%c0_16, %c0_17] : memref<128x32xf32, #tpu.memory_space<vmem>>, vector<128x32xf32>
      %20 = arith.truncf %19 : vector<128x32xf32> to vector<128x32xbf16>
      %c0_18 = arith.constant 0 : index
      %c0_19 = arith.constant 0 : index
      %21 = vector.load %arg9[%c0_18, %c0_19] : memref<32x256xbf16, #tpu.memory_space<vmem>>, vector<32x256xbf16>
      %cst_20 = arith.constant dense<0.000000e+00> : vector<128x256xf32>
      %22 = tpu.matmul %20, %21, %cst_20 {dimension_numbers = #tpu.dot_dimension_numbers<[1], [0], [0], [1], [0, 0, 1, 1], [], []>} : vector<128x32xbf16>, vector<32x256xbf16>, vector<128x256xf32> -> vector<128x256xf32>
      %23 = arith.addf %18, %22 : vector<128x256xf32>
      %c0_21 = arith.constant 0 : index
      %c0_22 = arith.constant 0 : index
      %24 = vector.load %arg10[%c0_21, %c0_22] : memref<128x256xf32, #tpu.memory_space<vmem>>, vector<128x256xf32>
      tpu.vector_store %arg10[%c0_21, %c0_22], %23 {strides = array<i32>} : memref<128x256xf32, #tpu.memory_space<vmem>>, vector<128x256xf32>,
    } else {
    }
    return
  }
  func.func @transform_0(%arg0: i32, %arg1: i32, %arg2: i32) -> (i32, i32) {
    %c0_i32 = arith.constant 0 : i32
    %c0_i32_0 = arith.constant 0 : i32
    return %arg0, %c0_i32 : i32, i32
  }
  func.func @transform_1(%arg0: i32, %arg1: i32, %arg2: i32) -> (i32, i32) {
    %c0_i32 = arith.constant 0 : i32
    %c0_i32_0 = arith.constant 0 : i32
    %c0_i32_1 = arith.constant 0 : i32
    return %c0_i32, %c0_i32_0 : i32, i32
  }
  func.func @transform_2(%arg0: i32, %arg1: i32, %arg2: i32) -> (i32, i32) {
    %c0_i32 = arith.constant 0 : i32
    return %arg0, %arg2 : i32, i32
  }
  func.func @transform_3(%arg0: i32, %arg1: i32, %arg2: i32) -> (i32, i32) {
    %c0_i32 = arith.constant 0 : i32
    return %arg2, %arg1 : i32, i32
  }
  func.func @transform_4(%arg0: i32, %arg1: i32, %arg2: i32) -> (i32, i32) {
    %c0_i32 = arith.constant 0 : i32
    %c0_i32_0 = arith.constant 0 : i32
    return %c0_i32, %arg1 : i32, i32
  }
  func.func @transform_5(%arg0: i32, %arg1: i32, %arg2: i32) -> (i32, i32) {
    %c0_i32 = arith.constant 0 : i32
    %c0_i32_0 = arith.constant 0 : i32
    return %arg2, %c0_i32 : i32, i32
  }
  func.func @transform_6(%arg0: i32, %arg1: i32, %arg2: i32) -> (i32, i32) {
    %c0_i32 = arith.constant 0 : i32
    %c0_i32_0 = arith.constant 0 : i32
    return %c0_i32, %arg1 : i32, i32
  }
  func.func @transform_7(%arg0: i32, %arg1: i32, %arg2: i32) -> (i32, i32) {
    %c0_i32 = arith.constant 0 : i32
    return %arg0, %arg1 : i32, i32
  }
}

</mosaic_0001>

<bundles_post_ra>
// kernel: tpu_custom_call.1
= control target key start
LH: loop header
LB: loop body
LE: loop exit
PB: predicated region body
PF: predicated region fallthrough
CT: control target
= control target key end

     0   :  { %12 = vsyncpa [#allocation5], 0  ;;  %s3494_s0 = inlined_call_operand.vmem [shape: s32[256,1], index: 0, kind: input, shape index: {}]   ;;  %s3495_s1 = inlined_call_operand.vmem [shape: s32[1,32], index: 1, kind: input, shape index: {}]   ;;  %s3496_s2 = inlined_call_operand.vmem [shape: bf16[256,256], index: 2, kind: input, shape index: {}]   ;;  %s3497_s3 = inlined_call_operand.hbm [shape: bf16[256,512], index: 3, kind: input, shape index: {}]   ;;  %s3498_s4 = inlined_call_operand.vmem [shape: f32[1,512], index: 4, kind: input, shape index: {}]   ;;  %s3499_s5 = inlined_call_operand.vmem [shape: bf16[256,32], index: 5, kind: input, shape index: {}]   ;;  %s3500_s6 = inlined_call_operand.vmem [shape: bf16[32,512], index: 6, kind: input, shape index: {}]   ;;  %s3501_s7 = inlined_call_operand.hbm [shape: f32[256,512], index: 7, kind: output, shape index: {}]  }
   0x1   :  { %14 = vsyncpa [#allocation5 + $0x1], 0 }
   0x2   :  { %15 = vsyncpa [#allocation6], 0 }
   0x3   :  { %17 = vsyncpa [#allocation6 + $0x1], 0  ;;  %s2810_s24 = smov 0   ;;  %s2812_s25 = smov 0  }
   0x4   :  { %s2814_s26 = smov 0   ;;  %s2816_s27 = smov 0  }
   0x5   :  { %s2818_s28 = smov 0   ;;  %s2820_s29 = smov 0  }
   0x6   :  { %s2822_s30 = smov 0   ;;  %s2824_s8 = smov 0  }
   0x7   :  { %s2826_s9 = smov 0   ;;  %s2828_s10 = smov 0  }
   0x8   :  { %s2830_s11 = smov 0  }
   0x9 LB: > { %3512 = sst [smem:[#allocation11_spill]] %s2720_s24  ;;  %s2075_s12 = sadd.s32 4294967295, %s2760_s11   ;;  %s2760_s11 = sphi %s2830_s11, %s23_s11   ;;  %s2756_s10 = sphi %s2828_s10, %s3538_s10   ;;  %s2752_s9 = sphi %s2826_s9, %s3537_s9   ;;  %s2748_s8 = sphi %s2824_s8, %s3536_s8   ;;  %s2744_s30 = sphi %s2822_s30, %s3535_s30   ;;  %s2740_s29 = sphi %s2820_s29, %s3543_s29   ;;  %s2736_s28 = sphi %s2818_s28, %s3542_s28   ;;  %s2732_s27 = sphi %s2816_s27, %s3541_s27   ;;  %s2728_s26 = sphi %s2814_s26, %s3532_s26   ;;  %s2724_s25 = sphi %s2812_s25, %s3540_s25   ;;  %s2720_s24 = sphi %s2810_s24, %s3539_s24  }
   0xa   : > { %3513 = sst [smem:[#allocation12_spill]] %s2728_s26  ;;  %s2076_s13 = sadd.s32 4294967294, %s2760_s11  }
   0xb   : > { %3514 = sst [smem:[#allocation13_spill]] %s2740_s29  ;;  %s38_s14 = sadd.s32 1, %s2752_s9 }
   0xc   : > { %3515 = sst [smem:[#allocation14_spill]] %s2752_s9  ;;  %s42_s15 = sadd.s32 1, %s2756_s10 }
   0xd   : > { %3516 = sst [smem:[#allocation15_spill]] %s2756_s10  ;;  %p40_p0 = scmp.ge.s32.totalorder %s38_s14, 2 }
   0xe   : > { %s126_s16 = sadd.s32 1, %s2740_s29  ;;  %p133_p1 = scmp.ne.s32.totalorder %s2740_s29, %s2736_s28 }
   0xf   : > { %p134_p2 = scmp.eq.s32.totalorder %s2760_s11, 0  ;;  %s3545_s14 = smov (%p40_p0, %s38_s14), 0 }
  0x10   : > { %3517 = sst [smem:[#allocation16_spill]] %s3545_s14  ;;  %s3547_s15 = smov (!%p40_p0, %s42_s15), %s2756_s10 }
  0x11   : > { %s122_s17 = ssub.s32 %s2752_s9, %s3545_s14  ;;  %p2876_p3 = por %p134_p2, %p133_p1 }
  0x12   : > { %p44_p4 = scmp.ge.s32.totalorder %s3547_s15, 2  ;;  %p124_p5 = scmp.eq.s32.totalorder %s122_s17, 0 }
  0x13   : > { %p139_p6 = scmp.ne.s32.totalorder %s2736_s28, %s2732_s27  ;;  %p140_p7 = scmp.eq.s32.totalorder %s2075_s12, 0 }
  0x14   : > { %s3549_s15 = smov (%p44_p4, %s3547_s15), 0  ;;  %s232_s23 = sadd.s32 1, %s2728_s26 }
  0x15   : > { %3519 = sst [smem:[#allocation17_spill]] %s3549_s15  ;;  %p2886_p8 = por %p140_p7, %p139_p6 }
  0x16   : > { %s2884_s19 = scalar_select %p124_p5, %s2740_s29, %s126_s16  }
  0x17   : > { %s227_s21 = ssub.s32 %s2756_s10, %s3549_s15  ;;  %p242_p10 = scmp.ne.s32.totalorder %s2728_s26, %s2724_s25 }
  0x18   : > { %3520 = sst [smem:[#allocation18_spill]] %s2884_s19  ;;  %s229_s22 = sor.u32 %s227_s21, %s122_s17 }
  0x19   : > { %p230_p9 = scmp.eq.s32.totalorder %s229_s22, 0  ;;  %p243_p11 = scmp.eq.s32.totalorder %s2075_s12, 3 }
  0x1a   : > { %p248_p12 = scmp.ne.s32.totalorder %s2724_s25, %s2720_s24  ;;  %p249_p0 = scmp.eq.s32.totalorder %s2076_s13, 3 }
  0x1b   : > { %s2898_s14 = scalar_select %p230_p9, %s2728_s26, %s232_s23  }
  0x1c   : > { %p2900_p13 = por %p243_p11, %p242_p10  ;;  %p2904_p1 = por %p249_p0, %p248_p12 }
  0x1d   : > { %3522 = sst [smem:[#allocation19_spill]] %s2898_s14  ;;  %p2079_p2 = scmp.ge.s32.totalorder %s2760_s11, 4 }
  0x1e   : > { %s3523_s27 = scalar_select %p2900_p13, 1, 0 }
  0x1f   : > { %s3525_s16 = scalar_select %p2904_p1, 1, 0 }
  0x20   : > { %3524 = sst [smem:[#allocation20_spill]] %s3523_s27  ;;  %277 = sbr.rel (%p2079_p2) target bundleno = 47 (0x2f), region = 24 }
  0x21   : > { %3526 = sst [smem:[#allocation21_spill]] %s3525_s16  ;;  %s305_s17 = sand.u32 (!%p2079_p2), 1, %s2740_s29  }
  0x22   : > { %s2408_s12 = sshll.u32 (!%p2079_p2), %s2752_s9, 3  ;;  %s2080_s21 = sshll.u32 (!%p2079_p2), %s305_s17, 8 }
  0x23   : > { %s317_s15 = scalar_lea.hbm (!%p2079_p2), %s3497_s3, %s2408_s12  ;;  %s309_s19 = scalar_lea.vmem (!%p2079_p2), [#allocation4], %s2080_s21 }
  0x24   : > { %s318_s10 = sshll.u32 (!%p2079_p2), %s317_s15, 4  ;;  %s320_s13 = sshll.u32 (!%p2079_p2), %s309_s19, 4  ;;  %s319_s10 = int_to_ptr.hbm [resolvable:$true] %s318_s10  ;;  %s321_s13 = int_to_ptr.vmem [resolvable:$true] %s320_s13 }
  0x25   : > { %s306_s14 = scalar_lea.sflag [#allocation5], %s305_s17  ;;  %s2762_s26 = smov 256  }
  0x26   : > { %s2763_s16 = smov 128   ;;  %s2764_s24 = smov 8  }
  0x27   : > { %2500 = dma.hbm_to_vmem [thread:$0]  (%p2876_p3), %s319_s10, 4096, %s321_s13, %s306_s14, %s2762_s26, %s2763_s16, %s2764_s24  }
  0x28   : > { %337 = sbr.rel (!%p2876_p3) target bundleno = 47 (0x2f), region = 44  ;;  %s2083_s9 = sshll.u32 (%p2876_p3), %s305_s17, 5 }
  0x29   : > { %s344_s22 = scalar_lea.vmem (%p2876_p3), %s3500_s6, %s2408_s12  ;;  %s341_s15 = scalar_lea.vmem (%p2876_p3), [#allocation7], %s2083_s9 }
  0x2a   : > { %v379_v0 = vld [vmem:[%s344_s22] sm:$0xff] (%p2876_p3)  ;;  %v381_v1 = vld [vmem:[%s344_s22 + $0x10] sm:$0xff] (%p2876_p3) }
  0x2b   : > { %v383_v2 = vld [vmem:[%s344_s22 + $0x20] sm:$0xff] (%p2876_p3)  ;;  %380 = vst [vmem:[%s341_s15] sm:$0xff] (%p2876_p3), %v379_v0  ;;  %v385_v3 = vld [vmem:[%s344_s22 + $0x30] sm:$0xff] (%p2876_p3) }
  0x2c   : > { %382 = vst [vmem:[%s341_s15 + $0x8] sm:$0xff] (%p2876_p3), %v381_v1 }
  0x2d   : > { %384 = vst [vmem:[%s341_s15 + $0x10] sm:$0xff] %v383_v2 }
  0x2e   : > { %386 = vst [vmem:[%s341_s15 + $0x18] sm:$0xff] %v385_v3 }
  0x2f PF: > { %p2086_p4 = scmp.ge.s32.totalorder %s2760_s11, 1  ;;  %p391_p3 = scmp.lt.s32.totalorder %s2760_s11, 5 }
  0x31   : > { %p392_p5 = pnand %p2086_p4, %p391_p3 }
  0x32   : > { %s2924_s24 = sand.u32 (!%p392_p5), 1, %s2736_s28  }
  0x33   : > { %395 = sbr.rel (%p392_p5) target bundleno = 792 (0x318), region = 82  ;;  %s2087_s26 = sshll.u32 (!%p392_p5), %s2924_s24, 8 }
  0x34   : > { %s398_s29 = scalar_lea.sflag (!%p392_p5), [#allocation5], %s2924_s24  ;;  %s2928_s9 = scalar_lea.vmem (!%p392_p5), [#allocation4], %s2087_s26 }
  0x38   : > { %2711 = dma.done.wait (%p2886_p8), %s398_s29, 4096  }
  0x39   : > { %2713 = vsyncadd (%p2886_p8), %s398_s29, 4294963200  ;;  %s2088_s10 = sshll.u32 %s2924_s24, 5  ;;  %s465_s14 = sand.u32 1, %s2724_s25   ;;  %v2218_v4 = vld [vmem:[%s2928_s9 + $0x70] sm:$0xf] }
  0x3a   : > { %s2938_s18 = sshll.u32 %s465_s14, 8  ;;  %s2941_s19 = sshll.u32 %s2744_s30, 1  ;;  %v2442_v5 = vld [vmem:[%s2928_s9 + $0x74] sm:$0xf0]  ;;  %v2282_v6 = vld [vmem:[%s2928_s9 + $0xf0] sm:$0xf] }
  0x3b   : > { %p489_p6 = scmp.lt.s32.totalorder %s2941_s19, 3  ;;  %s2090_s27 = sshll.u32 %s2748_s8, 4  ;;  %v2219_v7 = vor.u32 %v2442_v5, %v2218_v4  ;;  %v2458_v8 = vld [vmem:[%s2928_s9 + $0xf4] sm:$0xf0]  ;;  %v2441_v9 = vld [vmem:[%s2928_s9 + $0x74] sm:$0xf] }
  0x3c   : > { %v2220_v10 = vld [vmem:[%s2928_s9 + $0x78] sm:$0xf0]  ;;  %v2283_v11 = vor.u32 %v2458_v8, %v2282_v6  ;;  %v2457_v13 = vld [vmem:[%s2928_s9 + $0xf4] sm:$0xf]  ;;  %v2210_v15 = vld [vmem:[%s2928_s9 + $0x60] sm:$0xf] }
  0x3d   : > { %s2945_s20 = scalar_select %p489_p6, %s2941_s19, 3  ;;  %v2223_v12 = vor.u32 %v2441_v9, %v2220_v10  ;;  %v2284_v14 = vld [vmem:[%s2928_s9 + $0xf8] sm:$0xf0]  ;;  %859 = vmatpush.bf16.msra.mxu0 %v2219_v7  ;;  %v2440_v17 = vld [vmem:[%s2928_s9 + $0x64] sm:$0xf0] }
  0x3e   : > { %v2287_v16 = vor.u32 %v2457_v13, %v2284_v14  ;;  %v2274_v18 = vld [vmem:[%s2928_s9 + $0xe0] sm:$0xf]  ;;  %v2456_v19 = vld [vmem:[%s2928_s9 + $0xe4] sm:$0xf0]  ;;  %908 = vmatpush.bf16.msra.mxu1 %v2283_v11  ;;  %v2211_v20 = vor.u32 %v2440_v17, %v2210_v15  ;;  %v2439_v22 = vld [vmem:[%s2928_s9 + $0x64] sm:$0xf] }
  0x3f   : > { %s491_s12 = scalar_lea.vmem %s3498_s4, %s2945_s20  ;;  %957 = vmatpush.bf16.msra.mxu2 %v2223_v12  ;;  %v2275_v21 = vor.u32 %v2456_v19, %v2274_v18  ;;  %v2212_v23 = vld [vmem:[%s2928_s9 + $0x68] sm:$0xf0]  ;;  %v2455_v24 = vld [vmem:[%s2928_s9 + $0xe4] sm:$0xf]  ;;  %v2202_v27 = vld [vmem:[%s2928_s9 + $0x50] sm:$0xf] }
  0x40   : > { %1006 = vmatpush.bf16.msra.mxu3 %v2287_v16  ;;  %v2215_v25 = vor.u32 %v2439_v22, %v2212_v23  ;;  %v2276_v26 = vld [vmem:[%s2928_s9 + $0xe8] sm:$0xf0]  ;;  %v2438_v28 = vld [vmem:[%s2928_s9 + $0x54] sm:$0xf0]  ;;  %v2266_v30 = vld [vmem:[%s2928_s9 + $0xd0] sm:$0xf] }
  0x41   : > { %v2279_v29 = vor.u32 %v2455_v24, %v2276_v26  ;;  %v2454_v31 = vld [vmem:[%s2928_s9 + $0xd4] sm:$0xf0]  ;;  %v2437_v32 = vld [vmem:[%s2928_s9 + $0x54] sm:$0xf]  ;;  %860 = vmatpush.bf16.msra.mxu0 %v2211_v20  ;;  %v2203_v33 = vor.u32 %v2438_v28, %v2202_v27  ;;  %v2204_v34 = vld [vmem:[%s2928_s9 + $0x58] sm:$0xf0] }
  0x42   : > { %v2453_v35 = vld [vmem:[%s2928_s9 + $0xd4] sm:$0xf]  ;;  %v2268_v36 = vld [vmem:[%s2928_s9 + $0xd8] sm:$0xf0]  ;;  %909 = vmatpush.bf16.msra.mxu1 %v2275_v21  ;;  %v2267_v37 = vor.u32 %v2454_v31, %v2266_v30  ;;  %v2207_v38 = vor.u32 %v2437_v32, %v2204_v34  ;;  %v2194_v39 = vld [vmem:[%s2928_s9 + $0x40] sm:$0xf] }
  0x43   : > { %958 = vmatpush.bf16.msra.mxu2 %v2215_v25  ;;  %v2436_v40 = vld [vmem:[%s2928_s9 + $0x44] sm:$0xf0]  ;;  %v2258_v41 = vld [vmem:[%s2928_s9 + $0xc0] sm:$0xf]  ;;  %v2271_v42 = vor.u32 %v2453_v35, %v2268_v36  ;;  %v2435_v44 = vld [vmem:[%s2928_s9 + $0x44] sm:$0xf] }
  0x44   : > { %1007 = vmatpush.bf16.msra.mxu3 %v2279_v29  ;;  %v2452_v43 = vld [vmem:[%s2928_s9 + $0xc4] sm:$0xf0]  ;;  %v2196_v45 = vld [vmem:[%s2928_s9 + $0x48] sm:$0xf0]  ;;  %v2451_v46 = vld [vmem:[%s2928_s9 + $0xc4] sm:$0xf]  ;;  %v2195_v48 = vor.u32 %v2436_v40, %v2194_v39 }
  0x45   : > { %v2260_v47 = vld [vmem:[%s2928_s9 + $0xc8] sm:$0xf0]  ;;  %861 = vmatpush.bf16.msra.mxu0 %v2203_v33  ;;  %p2986_p7 = scmp.lt.s32.totalorder %s2090_s27, 31  ;;  %v2259_v49 = vor.u32 %v2452_v43, %v2258_v41  ;;  %v2199_v50 = vor.u32 %v2435_v44, %v2196_v45  ;;  %v2186_v51 = vld [vmem:[%s2928_s9 + $0x30] sm:$0xf]  ;;  %s3140_s16 = scalar_lea.vmem [#allocation8], %s2938_s18 }
  0x46   : > { %910 = vmatpush.bf16.msra.mxu1 %v2267_v37  ;;  %v2434_v52 = vld [vmem:[%s2928_s9 + $0x34] sm:$0xf0]  ;;  %v2250_v53 = vld [vmem:[%s2928_s9 + $0xb0] sm:$0xf]  ;;  %v2263_v54 = vor.u32 %v2451_v46, %v2260_v47  ;;  %v2433_v56 = vld [vmem:[%s2928_s9 + $0x34] sm:$0xf] }
  0x47   : > { %959 = vmatpush.bf16.msra.mxu2 %v2207_v38  ;;  %v2450_v55 = vld [vmem:[%s2928_s9 + $0xb4] sm:$0xf0]  ;;  %v2188_v57 = vld [vmem:[%s2928_s9 + $0x38] sm:$0xf0]  ;;  %v2449_v58 = vld [vmem:[%s2928_s9 + $0xb4] sm:$0xf]  ;;  %v2187_v60 = vor.u32 %v2434_v52, %v2186_v51 }
  0x48   : > { %1008 = vmatpush.bf16.msra.mxu3 %v2271_v42  ;;  %v2252_v59 = vld [vmem:[%s2928_s9 + $0xb8] sm:$0xf0]  ;;  %s3551_s27 = smov (!%p2986_p7, %s2090_s27), 31  ;;  %v2251_v61 = vor.u32 %v2450_v55, %v2250_v53  ;;  %v2191_v62 = vor.u32 %v2433_v56, %v2188_v57  ;;  %v2178_v63 = vld [vmem:[%s2928_s9 + $0x20] sm:$0xf]  ;;  %p2288_p8 = scmp.ne.s32.totalorder %s2744_s30, 0 }
  0x49   : > { %862 = vmatpush.bf16.msra.mxu0 %v2195_v48  ;;  %v2432_v0 = vld [vmem:[%s2928_s9 + $0x24] sm:$0xf0]  ;;  %v2242_v1 = vld [vmem:[%s2928_s9 + $0xa0] sm:$0xf]  ;;  %v2255_v2 = vor.u32 %v2449_v58, %v2252_v59  ;;  %v2431_v4 = vld [vmem:[%s2928_s9 + $0x24] sm:$0xf] }
  0x4a   : > { %911 = vmatpush.bf16.msra.mxu1 %v2259_v49  ;;  %v2448_v3 = vld [vmem:[%s2928_s9 + $0xa4] sm:$0xf0]  ;;  %v2180_v5 = vld [vmem:[%s2928_s9 + $0x28] sm:$0xf0]  ;;  %v2447_v6 = vld [vmem:[%s2928_s9 + $0xa4] sm:$0xf]  ;;  %v2179_v8 = vor.u32 %v2432_v0, %v2178_v63 }
  0x4b   : > { %960 = vmatpush.bf16.msra.mxu2 %v2199_v50  ;;  %v2244_v7 = vld [vmem:[%s2928_s9 + $0xa8] sm:$0xf0]  ;;  %v2170_v9 = vld [vmem:[%s2928_s9 + $0x10] sm:$0xf]  ;;  %v2243_v10 = vor.u32 %v2448_v3, %v2242_v1  ;;  %v2183_v11 = vor.u32 %v2431_v4, %v2180_v5  ;;  %v2430_v12 = vld [vmem:[%s2928_s9 + $0x14] sm:$0xf0] }
  0x4c   : > { %1009 = vmatpush.bf16.msra.mxu3 %v2263_v54  ;;  %v2234_v13 = vld [vmem:[%s2928_s9 + $0x90] sm:$0xf]  ;;  %v2446_v14 = vld [vmem:[%s2928_s9 + $0x94] sm:$0xf0]  ;;  %v2247_v15 = vor.u32 %v2447_v6, %v2244_v7  ;;  %v2429_v16 = vld [vmem:[%s2928_s9 + $0x14] sm:$0xf]  ;;  %v2171_v20 = vor.u32 %v2430_v12, %v2170_v9 }
  0x4d   : > { %863 = vmatpush.bf16.msra.mxu0 %v2187_v60  ;;  %v2172_v17 = vld [vmem:[%s2928_s9 + $0x18] sm:$0xf0]  ;;  %s2091_s23 = sshll.u32 %s3551_s27, 3  ;;  %v2445_v18 = vld [vmem:[%s2928_s9 + $0x94] sm:$0xf]  ;;  %v2235_v21 = vor.u32 %v2446_v14, %v2234_v13 }
  0x4e   : > { %912 = vmatpush.bf16.msra.mxu1 %v2251_v61  ;;  %v2236_v19 = vld [vmem:[%s2928_s9 + $0x98] sm:$0xf0]  ;;  %s3024_s15 = scalar_lea.vmem %s3494_s0, %s2091_s23  ;;  %v2175_v22 = vor.u32 %v2429_v16, %v2172_v17  ;;  %v2162_v23 = vld [vmem:[%s2928_s9] sm:$0xf]  ;;  %v2428_v24 = vld [vmem:[%s2928_s9 + $0x4] sm:$0xf0]  ;;  %s3032_s27 = scalar_lea.vmem %s3496_s2, %s2091_s23 }
  0x4f   : > { %961 = vmatpush.bf16.msra.mxu2 %v2191_v62  ;;  %v2226_v25 = vld [vmem:[%s2928_s9 + $0x80] sm:$0xf]  ;;  %v2239_v26 = vor.u32 %v2445_v18, %v2236_v19  ;;  %v2444_v27 = vld [vmem:[%s2928_s9 + $0x84] sm:$0xf0]  ;;  %v2427_v28 = vld [vmem:[%s2928_s9 + $0x4] sm:$0xf]  ;;  %v2163_v32 = vor.u32 %v2428_v24, %v2162_v23 }
  0x50   : > { %1010 = vmatpush.bf16.msra.mxu3 %v2255_v2  ;;  %v2164_v29 = vld [vmem:[%s2928_s9 + $0x8] sm:$0xf0]  ;;  %v2443_v30 = vld [vmem:[%s2928_s9 + $0x84] sm:$0xf]  ;;  %v2098_v33 = vld [vmem:[%s3032_s27] sm:$0xf]  ;;  %v2227_v35 = vor.u32 %v2444_v27, %v2226_v25 }
  0x51   : > { %864 = vmatpush.bf16.msra.mxu0 %v2179_v8  ;;  %v2228_v31 = vld [vmem:[%s2928_s9 + $0x88] sm:$0xf0]  ;;  %v2412_v34 = vld [vmem:[%s3032_s27 + $0x4] sm:$0xf0]  ;;  %v2167_v36 = vor.u32 %v2427_v28, %v2164_v29  ;;  %v2411_v37 = vld [vmem:[%s3032_s27 + $0x4] sm:$0xf] }
  0x52   : > { %913 = vmatpush.bf16.msra.mxu1 %v2243_v10  ;;  %v2100_v38 = vld [vmem:[%s3032_s27 + $0x8] sm:$0xf0]  ;;  %v2231_v39 = vor.u32 %v2443_v30, %v2228_v31  ;;  %v3043_v40 = vor.u32 %v2412_v34, %v2098_v33  ;;  %v2106_v42 = vld [vmem:[%s3032_s27 + $0x10] sm:$0xf]  ;;  %v2414_v43 = vld [vmem:[%s3032_s27 + $0x14] sm:$0xf0] }
  0x53   : > { %962 = vmatpush.bf16.msra.mxu2 %v2183_v11  ;;  %v3045_v41 = vor.u32 %v2411_v37, %v2100_v38  ;;  %v2413_v44 = vld [vmem:[%s3032_s27 + $0x14] sm:$0xf]  ;;  %v2108_v45 = vld [vmem:[%s3032_s27 + $0x18] sm:$0xf0]  ;;  %v3055_v46 = vor.u32 %v2414_v43, %v2106_v42  ;;  %v2114_v48 = vld [vmem:[%s3032_s27 + $0x20] sm:$0xf] }
  0x54   : > { %1011 = vmatpush.bf16.msra.mxu3 %v2247_v15  ;;  %v3057_v47 = vor.u32 %v2413_v44, %v2108_v45  ;;  %v2416_v49 = vld [vmem:[%s3032_s27 + $0x24] sm:$0xf0]  ;;  %v2415_v50 = vld [vmem:[%s3032_s27 + $0x24] sm:$0xf]  ;;  %v2116_v51 = vld [vmem:[%s3032_s27 + $0x28] sm:$0xf0] }
  0x55   : > { %865 = vmatpush.bf16.msra.mxu0 %v2171_v20  ;;  %v3067_v52 = vor.u32 %v2416_v49, %v2114_v48  ;;  %v3069_v53 = vor.u32 %v2415_v50, %v2116_v51  ;;  %v2122_v54 = vld [vmem:[%s3032_s27 + $0x30] sm:$0xf]  ;;  %v2418_v55 = vld [vmem:[%s3032_s27 + $0x34] sm:$0xf0]  ;;  %v2417_v56 = vld [vmem:[%s3032_s27 + $0x34] sm:$0xf] }
  0x56   : > { %914 = vmatpush.bf16.msra.mxu1 %v2235_v21  ;;  %v2124_v57 = vld [vmem:[%s3032_s27 + $0x38] sm:$0xf0]  ;;  %v3079_v58 = vor.u32 %v2418_v55, %v2122_v54  ;;  %v2130_v60 = vld [vmem:[%s3032_s27 + $0x40] sm:$0xf]  ;;  %v2420_v61 = vld [vmem:[%s3032_s27 + $0x44] sm:$0xf0] }
  0x57   : > { %963 = vmatpush.bf16.msra.mxu2 %v2175_v22  ;;  %v3081_v59 = vor.u32 %v2417_v56, %v2124_v57  ;;  %v2419_v62 = vld [vmem:[%s3032_s27 + $0x44] sm:$0xf]  ;;  %v2132_v63 = vld [vmem:[%s3032_s27 + $0x48] sm:$0xf0]  ;;  %v3091_v0 = vor.u32 %v2420_v61, %v2130_v60  ;;  %v2138_v2 = vld [vmem:[%s3032_s27 + $0x50] sm:$0xf] }
  0x58   : > { %1012 = vmatpush.bf16.msra.mxu3 %v2239_v26  ;;  %v3093_v1 = vor.u32 %v2419_v62, %v2132_v63  ;;  %v2422_v3 = vld [vmem:[%s3032_s27 + $0x54] sm:$0xf0]  ;;  %v2421_v4 = vld [vmem:[%s3032_s27 + $0x54] sm:$0xf]  ;;  %v2140_v5 = vld [vmem:[%s3032_s27 + $0x58] sm:$0xf0] }
  0x59   : > { %866 = vmatpush.bf16.msra.mxu0 %v2163_v32  ;;  %v3103_v6 = vor.u32 %v2422_v3, %v2138_v2  ;;  %v3105_v7 = vor.u32 %v2421_v4, %v2140_v5  ;;  %v2146_v8 = vld [vmem:[%s3032_s27 + $0x60] sm:$0xf]  ;;  %v2424_v9 = vld [vmem:[%s3032_s27 + $0x64] sm:$0xf0]  ;;  %v2423_v10 = vld [vmem:[%s3032_s27 + $0x64] sm:$0xf] }
  0x5a   : > { %915 = vmatpush.bf16.msra.mxu1 %v2227_v35  ;;  %v2148_v11 = vld [vmem:[%s3032_s27 + $0x68] sm:$0xf0]  ;;  %v3115_v12 = vor.u32 %v2424_v9, %v2146_v8  ;;  %v2154_v14 = vld [vmem:[%s3032_s27 + $0x70] sm:$0xf]  ;;  %v2426_v15 = vld [vmem:[%s3032_s27 + $0x74] sm:$0xf0] }
  0x5b   : > { %964 = vmatpush.bf16.msra.mxu2 %v2167_v36  ;;  %v3117_v13 = vor.u32 %v2423_v10, %v2148_v11  ;;  %v2425_v16 = vld [vmem:[%s3032_s27 + $0x74] sm:$0xf]  ;;  %v2156_v17 = vld [vmem:[%s3032_s27 + $0x78] sm:$0xf0]  ;;  %v3127_v18 = vor.u32 %v2426_v15, %v2154_v14  ;;  %s3137_s9 = scalar_lea.vmem [#allocation7], %s2088_s10 }
  0x5c   : > { %1013 = vmatpush.bf16.msra.mxu3 %v2231_v39  ;;  %867 = vmatmul.bf16.vlgmr.msra.gmra.mxu0 %v3043_v40  ;;  %v3129_v19 = vor.u32 %v2425_v16, %v2156_v17 }
  0x5d   : > { %916 = vmatmul.bf16.vlgmr.msra.gmra.mxu1 %v3045_v41 }
  0x5e   : > { %965 = vmatmul.bf16.vlgmr.msra.gmra.mxu2 %v3043_v40 }
  0x5f   : > { %1014 = vmatmul.bf16.vlgmr.msra.gmra.mxu3 %v3045_v41 }
  0x6c   : > { %872 = vmatmul.bf16.gmra.mxu0 %v3055_v46 }
  0x6d   : > { %921 = vmatmul.bf16.gmra.mxu1 %v3057_v47 }
  0x6e   : > { %970 = vmatmul.bf16.gmra.mxu2 %v3055_v46 }
  0x6f   : > { %1019 = vmatmul.bf16.gmra.mxu3 %v3057_v47 }
  0x7c   : > { %877 = vmatmul.bf16.gmra.mxu0 %v3067_v52 }
  0x7d   : > { %926 = vmatmul.bf16.gmra.mxu1 %v3069_v53 }
  0x7e   : > { %975 = vmatmul.bf16.gmra.mxu2 %v3067_v52 }
  0x7f   : > { %1024 = vmatmul.bf16.gmra.mxu3 %v3069_v53 }
  0x8c   : > { %882 = vmatmul.bf16.gmra.mxu0 %v3079_v58 }
  0x8d   : > { %931 = vmatmul.bf16.gmra.mxu1 %v3081_v59 }
  0x8e   : > { %980 = vmatmul.bf16.gmra.mxu2 %v3079_v58 }
  0x8f   : > { %1029 = vmatmul.bf16.gmra.mxu3 %v3081_v59 }
  0x9c   : > { %887 = vmatmul.bf16.gmra.mxu0 %v3091_v0 }
  0x9d   : > { %936 = vmatmul.bf16.gmra.mxu1 %v3093_v1 }
  0x9e   : > { %985 = vmatmul.bf16.gmra.mxu2 %v3091_v0 }
  0x9f   : > { %1034 = vmatmul.bf16.gmra.mxu3 %v3093_v1 }
  0xac   : > { %892 = vmatmul.bf16.gmra.mxu0 %v3103_v6 }
  0xad   : > { %941 = vmatmul.bf16.gmra.mxu1 %v3105_v7 }
  0xae   : > { %990 = vmatmul.bf16.gmra.mxu2 %v3103_v6 }
  0xaf   : > { %1039 = vmatmul.bf16.gmra.mxu3 %v3105_v7 }
  0xbc   : > { %897 = vmatmul.bf16.gmra.mxu0 %v3115_v12 }
  0xbd   : > { %946 = vmatmul.bf16.gmra.mxu1 %v3117_v13 }
  0xbe   : > { %995 = vmatmul.bf16.gmra.mxu2 %v3115_v12 }
  0xbf   : > { %1044 = vmatmul.bf16.gmra.mxu3 %v3117_v13 }
  0xcc   : > { %902 = vmatmul.bf16.gmra.mxu0 %v3127_v18 }
  0xcd   : > { %951 = vmatmul.bf16.gmra.mxu1 %v3129_v19 }
  0xce   : > { %1000 = vmatmul.bf16.gmra.mxu2 %v3127_v18 }
  0xcf   : > { %1049 = vmatmul.bf16.gmra.mxu3 %v3129_v19 }
  0xd9   : > { %v868_v20 = vpop.f32.mrf.mxu0 }
  0xda   : > { %v917_v21 = vpop.f32.mrf.mxu1 }
  0xdb   : > { %v918_v22 = vadd.f32 %v917_v21, %v868_v20 }
  0xdd   : > { %1087 = vst [vmem:[#allocation2 + $0xb0] sm:$0xff] %v918_v22 }
  0xe1   : > { %v966_v23 = vpop.f32.mrf.mxu2  ;;  %v870_v25 = vpop.f32.mrf.mxu0 }
  0xe2   : > { %v1015_v24 = vpop.f32.mrf.mxu3  ;;  %v919_v27 = vpop.f32.mrf.mxu1 }
  0xe3   : > { %v1016_v26 = vadd.f32 %v1015_v24, %v966_v23  ;;  %v920_v28 = vadd.f32 %v919_v27, %v870_v25 }
  0xe5   : > { %1088 = vst [vmem:[#allocation2] sm:$0xff] %v1016_v26 }
  0xe6   : > { %1089 = vst [vmem:[#allocation2 + $0xd8] sm:$0xff] %v920_v28 }
  0xe9   : > { %v968_v29 = vpop.f32.mrf.mxu2  ;;  %v873_v31 = vpop.f32.mrf.mxu0 }
  0xea   : > { %v1017_v30 = vpop.f32.mrf.mxu3  ;;  %v922_v33 = vpop.f32.mrf.mxu1 }
  0xeb   : > { %v1018_v32 = vadd.f32 %v1017_v30, %v968_v29  ;;  %v923_v34 = vadd.f32 %v922_v33, %v873_v31 }
  0xed   : > { %1090 = vst [vmem:[#allocation2 + $0x18] sm:$0xff] %v1018_v32 }
  0xee   : > { %1091 = vst [vmem:[#allocation2 + $0x50] sm:$0xff] %v923_v34 }
  0xf1   : > { %v971_v35 = vpop.f32.mrf.mxu2  ;;  %v875_v37 = vpop.f32.mrf.mxu0 }
  0xf2   : > { %v1020_v36 = vpop.f32.mrf.mxu3  ;;  %v924_v39 = vpop.f32.mrf.mxu1 }
  0xf3   : > { %v1021_v38 = vadd.f32 %v1020_v36, %v971_v35  ;;  %v925_v42 = vadd.f32 %v924_v39, %v875_v37 }
  0xf5   : > { %1092 = vst [vmem:[#allocation2 + $0x68] sm:$0xff] %v1021_v38 }
  0xf6   : > { %1093 = vst [vmem:[#allocation2 + $0x30] sm:$0xff] %v925_v42 }
  0xf9   : > { %v973_v43 = vpop.f32.mrf.mxu2  ;;  %v878_v45 = vpop.f32.mrf.mxu0 }
  0xfa   : > { %v1022_v44 = vpop.f32.mrf.mxu3  ;;  %v927_v49 = vpop.f32.mrf.mxu1 }
  0xfb   : > { %v1023_v48 = vadd.f32 %v1022_v44, %v973_v43  ;;  %v928_v50 = vadd.f32 %v927_v49, %v878_v45 }
  0xfd   : > { %1094 = vst [vmem:[#allocation2 + $0x48] sm:$0xff] %v1023_v48 }
  0xfe   : > { %1095 = vst [vmem:[#allocation2 + $0x80] sm:$0xff] %v928_v50 }
 0x101   : > { %v976_v51 = vpop.f32.mrf.mxu2  ;;  %v880_v55 = vpop.f32.mrf.mxu0 }
 0x102   : > { %v1025_v54 = vpop.f32.mrf.mxu3  ;;  %v929_v57 = vpop.f32.mrf.mxu1 }
 0x103   : > { %v1026_v56 = vadd.f32 %v1025_v54, %v976_v51  ;;  %v930_v60 = vadd.f32 %v929_v57, %v880_v55 }
 0x105   : > { %1096 = vst [vmem:[#allocation2 + $0x88] sm:$0xff] %v1026_v56 }
 0x106   : > { %1097 = vst [vmem:[#allocation2 + $0xe8] sm:$0xff] %v930_v60 }
 0x109   : > { %v978_v61 = vpop.f32.mrf.mxu2  ;;  %v883_v63 = vpop.f32.mrf.mxu0 }
 0x10a   : > { %v1027_v62 = vpop.f32.mrf.mxu3  ;;  %v932_v3 = vpop.f32.mrf.mxu1 }
 0x10b   : > { %v1028_v2 = vadd.f32 %v1027_v62, %v978_v61  ;;  %v933_v4 = vadd.f32 %v932_v3, %v883_v63 }
 0x10d   : > { %1098 = vst [vmem:[#allocation2 + $0xb8] sm:$0xff] %v1028_v2 }
 0x10e   : > { %1099 = vst [vmem:[#allocation2 + $0x60] sm:$0xff] %v933_v4 }
 0x111   : > { %v981_v5 = vpop.f32.mrf.mxu2  ;;  %v885_v9 = vpop.f32.mrf.mxu0 }
 0x112   : > { %v1030_v8 = vpop.f32.mrf.mxu3  ;;  %v934_v11 = vpop.f32.mrf.mxu1 }
 0x113   : > { %v1031_v10 = vadd.f32 %v1030_v8, %v981_v5  ;;  %v935_v14 = vadd.f32 %v934_v11, %v885_v9 }
 0x115   : > { %1100 = vst [vmem:[#allocation2 + $0xf0] sm:$0xff] %v1031_v10 }
 0x116   : > { %1101 = vst [vmem:[#allocation2 + $0x8] sm:$0xff] %v935_v14 }
 0x119   : > { %v983_v15 = vpop.f32.mrf.mxu2  ;;  %v888_v17 = vpop.f32.mrf.mxu0 }
 0x11a   : > { %v1032_v16 = vpop.f32.mrf.mxu3  ;;  %v937_v21 = vpop.f32.mrf.mxu1 }
 0x11b   : > { %v1033_v20 = vadd.f32 %v1032_v16, %v983_v15  ;;  %v938_v22 = vadd.f32 %v937_v21, %v888_v17 }
 0x11d   : > { %1102 = vst [vmem:[#allocation2 + $0x78] sm:$0xff] %v1033_v20 }
 0x11e   : > { %1103 = vst [vmem:[#allocation2 + $0x38] sm:$0xff] %v938_v22 }
 0x121   : > { %v986_v23 = vpop.f32.mrf.mxu2  ;;  %v890_v25 = vpop.f32.mrf.mxu0 }
 0x122   : > { %v1035_v24 = vpop.f32.mrf.mxu3  ;;  %v939_v27 = vpop.f32.mrf.mxu1 }
 0x123   : > { %v1036_v26 = vadd.f32 %v1035_v24, %v986_v23  ;;  %v940_v28 = vadd.f32 %v939_v27, %v890_v25 }
 0x125   : > { %1104 = vst [vmem:[#allocation2 + $0x58] sm:$0xff] %v1036_v26 }
 0x126   : > { %1105 = vst [vmem:[#allocation2 + $0x40] sm:$0xff] %v940_v28 }
 0x129   : > { %v988_v29 = vpop.f32.mrf.mxu2  ;;  %v893_v31 = vpop.f32.mrf.mxu0 }
 0x12a   : > { %v1037_v30 = vpop.f32.mrf.mxu3  ;;  %v942_v33 = vpop.f32.mrf.mxu1 }
 0x12b   : > { %v1038_v32 = vadd.f32 %v1037_v30, %v988_v29  ;;  %v943_v34 = vadd.f32 %v942_v33, %v893_v31 }
 0x12d   : > { %1106 = vst [vmem:[#allocation2 + $0xc8] sm:$0xff] %v1038_v32 }
 0x12e   : > { %1107 = vst [vmem:[#allocation2 + $0xe0] sm:$0xff] %v943_v34 }
 0x131   : > { %v991_v35 = vpop.f32.mrf.mxu2  ;;  %v895_v37 = vpop.f32.mrf.mxu0 }
 0x132   : > { %v1040_v36 = vpop.f32.mrf.mxu3  ;;  %v944_v39 = vpop.f32.mrf.mxu1 }
 0x133   : > { %v1041_v38 = vadd.f32 %v1040_v36, %v991_v35  ;;  %v945_v42 = vadd.f32 %v944_v39, %v895_v37 }
 0x135   : > { %1108 = vst [vmem:[#allocation2 + $0x90] sm:$0xff] %v1041_v38 }
 0x136   : > { %1109 = vst [vmem:[#allocation2 + $0x70] sm:$0xff] %v945_v42 }
 0x139   : > { %v993_v43 = vpop.f32.mrf.mxu2  ;;  %v898_v45 = vpop.f32.mrf.mxu0 }
 0x13a   : > { %v1042_v44 = vpop.f32.mrf.mxu3  ;;  %v947_v49 = vpop.f32.mrf.mxu1 }
 0x13b   : > { %v1043_v48 = vadd.f32 %v1042_v44, %v993_v43  ;;  %v948_v50 = vadd.f32 %v947_v49, %v898_v45 }
 0x13d   : > { %1110 = vst [vmem:[#allocation2 + $0xc0] sm:$0xff] %v1043_v48 }
 0x13e   : > { %1111 = vst [vmem:[#allocation2 + $0xa8] sm:$0xff] %v948_v50 }
 0x141   : > { %v996_v51 = vpop.f32.mrf.mxu2  ;;  %v900_v55 = vpop.f32.mrf.mxu0 }
 0x142   : > { %v1045_v54 = vpop.f32.mrf.mxu3  ;;  %v949_v57 = vpop.f32.mrf.mxu1 }
 0x143   : > { %v1046_v56 = vadd.f32 %v1045_v54, %v996_v51  ;;  %v950_v60 = vadd.f32 %v949_v57, %v900_v55 }
 0x145   : > { %1112 = vst [vmem:[#allocation2 + $0xd0] sm:$0xff] %v1046_v56 }
 0x146   : > { %1113 = vst [vmem:[#allocation2 + $0x10] sm:$0xff] %v950_v60 }
 0x149   : > { %v998_v61 = vpop.f32.mrf.mxu2  ;;  %v903_v63 = vpop.f32.mrf.mxu0 }
 0x14a   : > { %v1047_v62 = vpop.f32.mrf.mxu3  ;;  %v952_v3 = vpop.f32.mrf.mxu1 }
 0x14b   : > { %v1048_v2 = vadd.f32 %v1047_v62, %v998_v61  ;;  %v953_v4 = vadd.f32 %v952_v3, %v903_v63 }
 0x14d   : > { %1114 = vst [vmem:[#allocation2 + $0x28] sm:$0xff] %v1048_v2 }
 0x14e   : > { %1115 = vst [vmem:[#allocation2 + $0xa0] sm:$0xff] %v953_v4 }
 0x151   : > { %v1001_v5 = vpop.f32.mrf.mxu2  ;;  %v905_v9 = vpop.f32.mrf.mxu0 }
 0x152   : > { %v1050_v8 = vpop.f32.mrf.mxu3  ;;  %v954_v11 = vpop.f32.mrf.mxu1 }
 0x153   : > { %v1051_v10 = vadd.f32 %v1050_v8, %v1001_v5  ;;  %v955_v14 = vadd.f32 %v954_v11, %v905_v9 }
 0x155   : > { %1116 = vst [vmem:[#allocation2 + $0xf8] sm:$0xff] %v1051_v10 }
 0x156   : > { %1117 = vst [vmem:[#allocation2 + $0x20] sm:$0xff] %v955_v14 }
 0x159   : > { %v1003_v15 = vpop.f32.mrf.mxu2  ;;  %1122 = sbr.rel (%p2288_p8) target bundleno = 586 (0x24a), region = 98 }
 0x15a   : > { %v1052_v16 = vpop.f32.mrf.mxu3 }
 0x15b   : > { %v1053_v17 = vadd.f32 %v1052_v16, %v1003_v15 }
 0x15d   : > { %1118 = vst [vmem:[#allocation2 + $0x98] sm:$0xff] %v1053_v17 }
 0x15e   : > { %v2466_v20 = vld [vmem:[%s3499_s5 + $0x38] sm:$0xff]  ;;  %v2465_v22 = vld [vmem:[%s3499_s5 + $0x30] sm:$0xff]  ;;  %v2765_v24 = vmov 0   ;;  %v1421_v25 = vld [vmem:[%s3024_s15] sm:$0xff]  ;;  %vm1126_vm0 = vcmask 261120  }
 0x15f   : > { %v2474_v21 = vld [vmem:[%s3499_s5 + $0x78] sm:$0xff]  ;;  %1287 = vmatpush.bf16.msra.mxu0 %v2466_v20  ;;  %2480 = vmatpush.bf16.msra.mxu2 %v2466_v20  ;;  %v2473_v23 = vld [vmem:[%s3499_s5 + $0x70] sm:$0xff]  ;;  %v2464_v26 = vld [vmem:[%s3499_s5 + $0x28] sm:$0xff] }
 0x160   : > { %1336 = vmatpush.bf16.msra.mxu1 %v2474_v21  ;;  %2488 = vmatpush.bf16.msra.mxu3 %v2474_v21  ;;  %v2472_v27 = vld [vmem:[%s3499_s5 + $0x68] sm:$0xff]  ;;  %v2463_v28 = vld [vmem:[%s3499_s5 + $0x20] sm:$0xff]  ;;  %v2462_v31 = vld [vmem:[%s3499_s5 + $0x18] sm:$0xff] }
 0x161   : > { %2606 = vset.pattern.permute.xlu0 %v2765_v24  ;;  %2607 = vset.pattern.permute.xlu1 %v2765_v24  ;;  %v2471_v29 = vld [vmem:[%s3499_s5 + $0x60] sm:$0xff]  ;;  %v1422_v30 = vld [vmem:[%s3024_s15 + $0x8] sm:$0xff]  ;;  %v2470_v32 = vld [vmem:[%s3499_s5 + $0x58] sm:$0xff] }
 0x162   : > { %2608 = vset.pattern.permute.xlu2 %v2765_v24  ;;  %1439 = vperm.xlu0 %2606, %v1421_v25   ;;  %v2461_v33 = vld [vmem:[%s3499_s5 + $0x10] sm:$0xff]  ;;  %v2460_v37 = vld [vmem:[%s3499_s5 + $0x8] sm:$0xff]  ;;  %v1424_v39 = vld [vmem:[%s3024_s15 + $0x18] sm:$0xff] }
 0x163   : > { %1288 = vmatpush.bf16.msra.mxu0 %v2465_v22  ;;  %2481 = vmatpush.bf16.msra.mxu2 %v2465_v22  ;;  %v1423_v34 = vld [vmem:[%s3024_s15 + $0x10] sm:$0xff]  ;;  %v2468_v38 = vld [vmem:[%s3499_s5 + $0x48] sm:$0xff]  ;;  %v2459_v42 = vld [vmem:[%s3499_s5] sm:$0xff] }
 0x164   : > { %1337 = vmatpush.bf16.msra.mxu1 %v2473_v23  ;;  %2489 = vmatpush.bf16.msra.mxu3 %v2473_v23  ;;  %v2469_v35 = vld [vmem:[%s3499_s5 + $0x50] sm:$0xff]  ;;  %v2467_v43 = vld [vmem:[%s3499_s5 + $0x40] sm:$0xff]  ;;  %v1430_v44 = vld [vmem:[%s3024_s15 + $0x48] sm:$0xff] }
 0x165   : > { %1445 = vperm.xlu1 %2607, %v1423_v34   ;;  %v1427_v36 = vld [vmem:[%s3024_s15 + $0x30] sm:$0xff]  ;;  %v1425_v45 = vld [vmem:[%s3024_s15 + $0x20] sm:$0xff]  ;;  %v1428_v48 = vld [vmem:[%s3024_s15 + $0x38] sm:$0xff] }
 0x166   : > { %1451 = vperm.xlu2 %2608, %v1425_v45   ;;  %v1433_v49 = vld [vmem:[%s3024_s15 + $0x60] sm:$0xff]  ;;  %v1426_v50 = vld [vmem:[%s3024_s15 + $0x28] sm:$0xff]  ;;  %v1431_v51 = vld [vmem:[%s3024_s15 + $0x50] sm:$0xff] }
 0x167   : > { %1289 = vmatpush.bf16.msra.mxu0 %v2464_v26  ;;  %2482 = vmatpush.bf16.msra.mxu2 %v2464_v26  ;;  %v1435_v54 = vld [vmem:[%s3024_s15 + $0x70] sm:$0xff] }
 0x168   : > { %1338 = vmatpush.bf16.msra.mxu1 %v2472_v27  ;;  %2490 = vmatpush.bf16.msra.mxu3 %v2472_v27 }
 0x16a   : > { %1442 = vperm.xlu0 %2606, %v1422_v30  }
 0x16b   : > { %1290 = vmatpush.bf16.msra.mxu0 %v2463_v28  ;;  %2483 = vmatpush.bf16.msra.mxu2 %v2463_v28 }
 0x16c   : > { %1339 = vmatpush.bf16.msra.mxu1 %v2471_v29  ;;  %2491 = vmatpush.bf16.msra.mxu3 %v2471_v29 }
 0x16d   : > { %1448 = vperm.xlu1 %2607, %v1424_v39  }
 0x16e   : > { %1454 = vperm.xlu2 %2608, %v1426_v50  }
 0x16f   : > { %1291 = vmatpush.bf16.msra.mxu0 %v2462_v31  ;;  %2484 = vmatpush.bf16.msra.mxu2 %v2462_v31 }
 0x170   : > { %1340 = vmatpush.bf16.msra.mxu1 %v2470_v32  ;;  %2492 = vmatpush.bf16.msra.mxu3 %v2470_v32 }
 0x172   : > { %1457 = vperm.xlu0 %2606, %v1427_v36  }
 0x173   : > { %1292 = vmatpush.bf16.msra.mxu0 %v2461_v33  ;;  %2485 = vmatpush.bf16.msra.mxu2 %v2461_v33 }
 0x174   : > { %1341 = vmatpush.bf16.msra.mxu1 %v2469_v35  ;;  %2493 = vmatpush.bf16.msra.mxu3 %v2469_v35 }
 0x175   : > { %1460 = vperm.xlu1 %2607, %v1428_v48  }
 0x177   : > { %1293 = vmatpush.bf16.msra.mxu0 %v2460_v37  ;;  %2486 = vmatpush.bf16.msra.mxu2 %v2460_v37 }
 0x178   : > { %1342 = vmatpush.bf16.msra.mxu1 %v2468_v38  ;;  %2494 = vmatpush.bf16.msra.mxu3 %v2468_v38 }
 0x17a   : > { %1466 = vperm.xlu0 %2606, %v1430_v44  }
 0x17b   : > { %1294 = vmatpush.bf16.msra.mxu0 %v2459_v42  ;;  %2487 = vmatpush.bf16.msra.mxu2 %v2459_v42 }
 0x17c   : > { %1343 = vmatpush.bf16.msra.mxu1 %v2467_v43  ;;  %2495 = vmatpush.bf16.msra.mxu3 %v2467_v43 }
 0x17d   : > { %1469 = vperm.xlu1 %2607, %v1431_v51  }
 0x17e   : > { %1295 = vmatmul.bf16.vlgmr.msra.gmra.mxu0 %v3043_v40  ;;  %1315 = vmatmul.bf16.vlgmr.msra.gmra.mxu2 %v3091_v0  ;;  %v1436_v40 = vld [vmem:[%s3024_s15 + $0x78] sm:$0xff]  ;;  %v1434_v0 = vld [vmem:[%s3024_s15 + $0x68] sm:$0xff] }
 0x17f   : > { %1344 = vmatmul.bf16.vlgmr.msra.gmra.mxu1 %v3045_v41  ;;  %1364 = vmatmul.bf16.vlgmr.msra.gmra.mxu3 %v3093_v1  ;;  %v1429_v41 = vld [vmem:[%s3024_s15 + $0x40] sm:$0xff]  ;;  %v1432_v1 = vld [vmem:[%s3024_s15 + $0x58] sm:$0xff] }
 0x180   : > { %1463 = vperm.xlu2 %2608, %v1429_v41  }
 0x182   : > { %1475 = vperm.xlu0 %2606, %v1433_v49  }
 0x185   : > { %1478 = vperm.xlu1 %2607, %v1434_v0  }
 0x188   : > { %1472 = vperm.xlu2 %2608, %v1432_v1  }
 0x18a   : > { %1484 = vperm.xlu0 %2606, %v1436_v40  }
 0x18e   : > { %1300 = vmatmul.bf16.gmra.mxu0 %v3055_v46  ;;  %1320 = vmatmul.bf16.gmra.mxu2 %v3103_v6  ;;  %v2766_v46 = vmov 0.0  }
 0x18f   : > { %1349 = vmatmul.bf16.gmra.mxu1 %v3057_v47  ;;  %1369 = vmatmul.bf16.gmra.mxu3 %v3105_v7  ;;  %1127 = vst.msk [vmem:[#allocation3] sm:$0xff] %vm1126_vm0, %v2766_v46 }
 0x190   : > { %1481 = vperm.xlu2 %2608, %v1435_v54   ;;  %1128 = vst.msk [vmem:[#allocation3 + $0x8] sm:$0xff] %vm1126_vm0, %v2766_v46 }
 0x191   : > { %1129 = vst.msk [vmem:[#allocation3 + $0x10] sm:$0xff] %vm1126_vm0, %v2766_v46 }
 0x192   : > { %1130 = vst.msk [vmem:[#allocation3 + $0x18] sm:$0xff] %vm1126_vm0, %v2766_v46 }
 0x193   : > { %1131 = vst.msk [vmem:[#allocation3 + $0x20] sm:$0xff] %vm1126_vm0, %v2766_v46 }
 0x194   : > { %1132 = vst.msk [vmem:[#allocation3 + $0x28] sm:$0xff] %vm1126_vm0, %v2766_v46 }
 0x195   : > { %1133 = vst.msk [vmem:[#allocation3 + $0x30] sm:$0xff] %vm1126_vm0, %v2766_v46 }
 0x196   : > { %1134 = vst.msk [vmem:[#allocation3 + $0x38] sm:$0xff] %vm1126_vm0, %v2766_v46  ;;  %v1143_v6 = vld [vmem:[#allocation3] sm:$0xff] }
 0x197   : > { %1135 = vst.msk [vmem:[#allocation3 + $0x40] sm:$0xff] %vm1126_vm0, %v2766_v46  ;;  %v1144_v63 = vld [vmem:[#allocation3 + $0x8] sm:$0xff] }
 0x198   : > { %1136 = vst.msk [vmem:[#allocation3 + $0x48] sm:$0xff] %vm1126_vm0, %v2766_v46  ;;  %v1145_v23 = vld [vmem:[#allocation3 + $0x10] sm:$0xff] }
 0x199   : > { %1137 = vst.msk [vmem:[#allocation3 + $0x50] sm:$0xff] %vm1126_vm0, %v2766_v46  ;;  %v1146_v43 = vld [vmem:[#allocation3 + $0x18] sm:$0xff] }
 0x19a   : > { %1138 = vst.msk [vmem:[#allocation3 + $0x58] sm:$0xff] %vm1126_vm0, %v2766_v46 }
 0x19b   : > { %1139 = vst.msk [vmem:[#allocation3 + $0x60] sm:$0xff] %vm1126_vm0, %v2766_v46 }
 0x19c   : > { %1140 = vst.msk [vmem:[#allocation3 + $0x68] sm:$0xff] %vm1126_vm0, %v2766_v46 }
 0x19d   : > { %1141 = vst.msk [vmem:[#allocation3 + $0x70] sm:$0xff] %vm1126_vm0, %v2766_v46 }
 0x19e   : > { %1305 = vmatmul.bf16.gmra.mxu0 %v3067_v52  ;;  %1325 = vmatmul.bf16.gmra.mxu2 %v3115_v12  ;;  %1142 = vst.msk [vmem:[#allocation3 + $0x78] sm:$0xff] %vm1126_vm0, %v2766_v46  ;;  %v1151_v56 = vld [vmem:[#allocation3 + $0x40] sm:$0xff] }
 0x19f   : > { %1354 = vmatmul.bf16.gmra.mxu1 %v3069_v53  ;;  %1374 = vmatmul.bf16.gmra.mxu3 %v3117_v13  ;;  %v1152_v16 = vld [vmem:[#allocation3 + $0x48] sm:$0xff] }
 0x1a0   : > { %v1153_v36 = vld [vmem:[#allocation3 + $0x50] sm:$0xff] }
 0x1ae   : > { %1310 = vmatmul.bf16.gmra.mxu0 %v3079_v58  ;;  %1330 = vmatmul.bf16.gmra.mxu2 %v3127_v18  ;;  %v3264_v18 = vld [vmem:[%s3495_s1] ss:$0 sm:$0xff] }
 0x1af   : > { %1359 = vmatmul.bf16.gmra.mxu1 %v3081_v59  ;;  %1379 = vmatmul.bf16.gmra.mxu3 %v3129_v19 }
 0x1c0   : > { %v3255_v52 = vpop.permute.xlu2 %1451 }
 0x1c1   : > { %vm1491_vm9 = vcmp.eq.s32.totalorder %v3255_v52, %v3264_v18 }
 0x1c8   : > { %v3259_v12 = vpop.permute.xlu2 %1454 }
 0x1c9   : > { %vm1492_vm11 = vcmp.eq.s32.totalorder %v3259_v12, %v3264_v18 }
 0x1d4   : > { %v1440_v47 = vpop.permute.xlu0 %1439 }
 0x1d5   : > { %vm1487_vm1 = vcmp.eq.s32.totalorder %v1440_v47, %v3264_v18  ;;  %v1154_v47 = vld [vmem:[#allocation3 + $0x58] sm:$0xff] }
 0x1d6   : > { %v2353_v5 = vsel %vm1487_vm1, 1.0, %v2766_v46 }
 0x1d7   : > { %v3257_v53 = vpop.permute.xlu1 %1445 }
 0x1d8   : > { %vm1489_vm5 = vcmp.eq.s32.totalorder %v3257_v53, %v3264_v18 }
 0x1d9   : > { %v2355_v51 = vsel %vm1489_vm5, 1.0, %v2766_v46 }
 0x1da   : > { %v1464_v9 = vpop.permute.xlu2 %1463 }
 0x1db   : > { %vm1495_vm2 = vcmp.eq.s32.totalorder %v1464_v9, %v3264_v18 }
 0x1dc   : > { %v1443_v58 = vpop.permute.xlu0 %1442  ;;  %v2361_v22 = vsel %vm1495_vm2, 1.0, %v2766_v46 }
 0x1dd   : > { %vm1488_vm3 = vcmp.eq.s32.totalorder %v1443_v58, %v3264_v18 }
 0x1de   : > { %v2354_v28 = vsel %vm1488_vm3, 1.0, %v2766_v46 }
 0x1df   : > { %v3267_v60 = vpop.permute.xlu1 %1448 }
 0x1e0   : > { %vm1490_vm7 = vcmp.eq.s32.totalorder %v3267_v60, %v3264_v18 }
 0x1e4   : > { %v3271_v8 = vpop.permute.xlu0 %1457 }
 0x1e5   : > { %vm1493_vm13 = vcmp.eq.s32.totalorder %v3271_v8, %v3264_v18 }
 0x1e7   : > { %v3279_v25 = vpop.permute.xlu1 %1460 }
 0x1e8   : > { %vm1494_vm15 = vcmp.eq.s32.totalorder %v3279_v25, %v3264_v18 }
 0x1ec   : > { %v1467_v33 = vpop.permute.xlu0 %1466 }
 0x1ed   : > { %vm1496_vm4 = vcmp.eq.s32.totalorder %v1467_v33, %v3264_v18 }
 0x1ee   : > { %v2362_v42 = vsel %vm1496_vm4, 1.0, %v2766_v46 }
 0x1ef   : > { %v1470_v50 = vpop.permute.xlu1 %1469 }
 0x1f0   : > { %vm1497_vm6 = vcmp.eq.s32.totalorder %v1470_v50, %v3264_v18 }
 0x1fb   : > { %v1296_v59 = vpop.f32.mrf.mxu0 }
 0x1fc   : > { %v1345_v7 = vpop.f32.mrf.mxu1 }
 0x1fd   : > { %v1346_v13 = vadd.f32 %v1345_v7, %v1296_v59  ;;  %v1147_v7 = vld [vmem:[#allocation3 + $0x20] sm:$0xff] }
 0x1ff   : > { %v1385_v19 = vadd.f32 %v1346_v13, %v1143_v6  ;;  %v2363_v6 = vsel %vm1497_vm6, 1.0, %v2766_v46 }
 0x201   : > { %1402 = vst.msk [vmem:[#allocation3] sm:$0xff] %vm1126_vm0, %v1385_v19  ;;  %v1316_v55 = vpop.f32.mrf.mxu2 }
 0x202   : > { %v1365_v57 = vpop.f32.mrf.mxu3 }
 0x203   : > { %v1366_v61 = vadd.f32 %v1365_v57, %v1316_v55  ;;  %v1298_v62 = vpop.f32.mrf.mxu0  ;;  %v2356_v57 = vsel %vm1490_vm7, 1.0, %v2766_v46 }
 0x204   : > { %v1347_v2 = vpop.f32.mrf.mxu1 }
 0x205   : > { %v1393_v3 = vadd.f32 %v1366_v61, %v1151_v56  ;;  %v1348_v4 = vadd.f32 %v1347_v2, %v1298_v62 }
 0x207   : > { %1410 = vst.msk [vmem:[#allocation3 + $0x40] sm:$0xff] %vm1126_vm0, %v1393_v3  ;;  %v1386_v10 = vadd.f32 %v1348_v4, %v1144_v63  ;;  %v1473_v63 = vpop.permute.xlu2 %1472  ;;  %v1155_v4 = vld [vmem:[#allocation3 + $0x60] sm:$0xff] }
 0x208   : > { %v1535_v11 = vld [vmem:[#allocation3] sm:$0xff]  ;;  %vm1498_vm8 = vcmp.eq.s32.totalorder %v1473_v63, %v3264_v18 }
 0x209   : > { %v1551_v14 = vmul.f32 %v2353_v5, %v1535_v11  ;;  %1403 = vst.msk [vmem:[#allocation3 + $0x8] sm:$0xff] %vm1126_vm0, %v1386_v10  ;;  %v1318_v15 = vpop.f32.mrf.mxu2  ;;  %v2364_v11 = vsel %vm1498_vm8, 1.0, %v2766_v46 }
 0x20a   : > { %v1367_v17 = vpop.f32.mrf.mxu3 }
 0x20b   : > { %1567 = vst.msk [vmem:[#allocation3] sm:$0xff] %vm1126_vm0, %v1551_v14  ;;  %v1368_v20 = vadd.f32 %v1367_v17, %v1318_v15  ;;  %v1301_v21 = vpop.f32.mrf.mxu0  ;;  %v1148_v14 = vld [vmem:[#allocation3 + $0x28] sm:$0xff] }
 0x20c   : > { %v1350_v24 = vpop.f32.mrf.mxu1 }
 0x20d   : > { %v1394_v26 = vadd.f32 %v1368_v20, %v1152_v16  ;;  %v1351_v27 = vadd.f32 %v1350_v24, %v1301_v21 }
 0x20e   : > { %v1543_v29 = vld [vmem:[#allocation3 + $0x40] sm:$0xff] }
 0x20f   : > { %1411 = vst.msk [vmem:[#allocation3 + $0x48] sm:$0xff] %vm1126_vm0, %v1394_v26  ;;  %v1559_v30 = vmul.f32 %v2361_v22, %v1543_v29  ;;  %v1387_v31 = vadd.f32 %v1351_v27, %v1145_v23  ;;  %v2357_v23 = vsel %vm1491_vm9, 1.0, %v2766_v46  ;;  %v1476_v27 = vpop.permute.xlu0 %1475  ;;  %v1156_v29 = vld [vmem:[#allocation3 + $0x68] sm:$0xff] }
 0x210   : > { %v1536_v32 = vld [vmem:[#allocation3 + $0x8] sm:$0xff]  ;;  %vm1499_vm10 = vcmp.eq.s32.totalorder %v1476_v27, %v3264_v18 }
 0x211   : > { %v1552_v34 = vmul.f32 %v2354_v28, %v1536_v32  ;;  %1575 = vst.msk [vmem:[#allocation3 + $0x40] sm:$0xff] %vm1126_vm0, %v1559_v30  ;;  %v1321_v35 = vpop.f32.mrf.mxu2  ;;  %v1149_v32 = vld [vmem:[#allocation3 + $0x30] sm:$0xff] }
 0x212   : > { %1404 = vst.msk [vmem:[#allocation3 + $0x10] sm:$0xff] %vm1126_vm0, %v1387_v31  ;;  %v1370_v37 = vpop.f32.mrf.mxu3 }
 0x213   : > { %1568 = vst.msk [vmem:[#allocation3 + $0x8] sm:$0xff] %vm1126_vm0, %v1552_v34  ;;  %v1371_v38 = vadd.f32 %v1370_v37, %v1321_v35  ;;  %v1303_v39 = vpop.f32.mrf.mxu0 }
 0x214   : > { %v1352_v44 = vpop.f32.mrf.mxu1 }
 0x215   : > { %v1395_v45 = vadd.f32 %v1371_v38, %v1153_v36  ;;  %v1353_v48 = vadd.f32 %v1352_v44, %v1303_v39  ;;  %v2365_v36 = vsel %vm1499_vm10, 1.0, %v2766_v46 }
 0x216   : > { %v1544_v49 = vld [vmem:[#allocation3 + $0x48] sm:$0xff] }
 0x217   : > { %v1560_v40 = vmul.f32 %v2362_v42, %v1544_v49  ;;  %1412 = vst.msk [vmem:[#allocation3 + $0x50] sm:$0xff] %vm1126_vm0, %v1395_v45  ;;  %v1388_v41 = vadd.f32 %v1353_v48, %v1146_v43  ;;  %v1479_v42 = vpop.permute.xlu1 %1478  ;;  %v2358_v43 = vsel %vm1492_vm11, 1.0, %v2766_v46  ;;  %v1157_v49 = vld [vmem:[#allocation3 + $0x70] sm:$0xff] }
 0x218   : > { %vm1500_vm12 = vcmp.eq.s32.totalorder %v1479_v42, %v3264_v18 }
 0x219   : > { %1576 = vst.msk [vmem:[#allocation3 + $0x48] sm:$0xff] %vm1126_vm0, %v1560_v40  ;;  %v1537_v0 = vld [vmem:[#allocation3 + $0x10] sm:$0xff]  ;;  %v1323_v1 = vpop.f32.mrf.mxu2  ;;  %v1150_v40 = vld [vmem:[#allocation3 + $0x38] sm:$0xff] }
 0x21a   : > { %v1553_v54 = vmul.f32 %v2355_v51, %v1537_v0  ;;  %1405 = vst.msk [vmem:[#allocation3 + $0x18] sm:$0xff] %vm1126_vm0, %v1388_v41  ;;  %v1372_v53 = vpop.f32.mrf.mxu3 }
 0x21b   : > { %v1373_v58 = vadd.f32 %v1372_v53, %v1323_v1  ;;  %v1306_v59 = vpop.f32.mrf.mxu0 }
 0x21c   : > { %1569 = vst.msk [vmem:[#allocation3 + $0x10] sm:$0xff] %vm1126_vm0, %v1553_v54  ;;  %v1355_v13 = vpop.f32.mrf.mxu1  ;;  %v2366_v54 = vsel %vm1500_vm12, 1.0, %v2766_v46 }
 0x21d   : > { %v1396_v19 = vadd.f32 %v1373_v58, %v1154_v47  ;;  %v1356_v55 = vadd.f32 %v1355_v13, %v1306_v59  ;;  %v1482_v59 = vpop.permute.xlu2 %1481 }
 0x21e   : > { %v1545_v56 = vld [vmem:[#allocation3 + $0x50] sm:$0xff]  ;;  %vm1501_vm14 = vcmp.eq.s32.totalorder %v1482_v59, %v3264_v18 }
 0x21f   : > { %1413 = vst.msk [vmem:[#allocation3 + $0x58] sm:$0xff] %vm1126_vm0, %v1396_v19  ;;  %v1561_v61 = vmul.f32 %v2363_v6, %v1545_v56  ;;  %v1389_v62 = vadd.f32 %v1356_v55, %v1147_v7  ;;  %v2359_v6 = vsel %vm1493_vm13, 1.0, %v2766_v46  ;;  %v1158_v55 = vld [vmem:[#allocation3 + $0x78] sm:$0xff] }
 0x221   : > { %v1538_v2 = vld [vmem:[#allocation3 + $0x18] sm:$0xff]  ;;  %1577 = vst.msk [vmem:[#allocation3 + $0x50] sm:$0xff] %vm1126_vm0, %v1561_v61  ;;  %v1326_v60 = vpop.f32.mrf.mxu2  ;;  %v2367_v61 = vsel %vm1501_vm14, 1.0, %v2766_v46 }
 0x222   : > { %v1554_v3 = vmul.f32 %v2356_v57, %v1538_v2  ;;  %1406 = vst.msk [vmem:[#allocation3 + $0x20] sm:$0xff] %vm1126_vm0, %v1389_v62  ;;  %v1375_v5 = vpop.f32.mrf.mxu3  ;;  %v1485_v2 = vpop.permute.xlu0 %1484 }
 0x223   : > { %v1376_v9 = vadd.f32 %v1375_v5, %v1326_v60  ;;  %v1308_v10 = vpop.f32.mrf.mxu0  ;;  %v2360_v60 = vsel %vm1494_vm15, 1.0, %v2766_v46  ;;  %vm1502_vm1 = vcmp.eq.s32.totalorder %v1485_v2, %v3264_v18 }
 0x224   : > { %1570 = vst.msk [vmem:[#allocation3 + $0x18] sm:$0xff] %vm1126_vm0, %v1554_v3  ;;  %v1357_v15 = vpop.f32.mrf.mxu1  ;;  %v2368_v5 = vsel %vm1502_vm1, 1.0, %v2766_v46 }
 0x225   : > { %v1397_v16 = vadd.f32 %v1376_v9, %v1155_v4  ;;  %v1358_v17 = vadd.f32 %v1357_v15, %v1308_v10 }
 0x226   : > { %v1546_v20 = vld [vmem:[#allocation3 + $0x58] sm:$0xff] }
 0x227   : > { %v1562_v21 = vmul.f32 %v2364_v11, %v1546_v20  ;;  %1414 = vst.msk [vmem:[#allocation3 + $0x60] sm:$0xff] %vm1126_vm0, %v1397_v16  ;;  %v1390_v22 = vadd.f32 %v1358_v17, %v1148_v14 }
 0x229   : > { %1578 = vst.msk [vmem:[#allocation3 + $0x58] sm:$0xff] %vm1126_vm0, %v1562_v21  ;;  %v1539_v24 = vld [vmem:[#allocation3 + $0x20] sm:$0xff]  ;;  %v1328_v26 = vpop.f32.mrf.mxu2 }
 0x22a   : > { %v1555_v28 = vmul.f32 %v2357_v23, %v1539_v24  ;;  %1407 = vst.msk [vmem:[#allocation3 + $0x28] sm:$0xff] %vm1126_vm0, %v1390_v22  ;;  %v1377_v30 = vpop.f32.mrf.mxu3 }
 0x22b   : > { %v1378_v52 = vadd.f32 %v1377_v30, %v1328_v26  ;;  %v1311_v31 = vpop.f32.mrf.mxu0 }
 0x22c   : > { %1571 = vst.msk [vmem:[#allocation3 + $0x20] sm:$0xff] %vm1126_vm0, %v1555_v28  ;;  %v1360_v33 = vpop.f32.mrf.mxu1 }
 0x22d   : > { %v1398_v34 = vadd.f32 %v1378_v52, %v1156_v29  ;;  %v1361_v35 = vadd.f32 %v1360_v33, %v1311_v31 }
 0x22e   : > { %v1547_v37 = vld [vmem:[#allocation3 + $0x60] sm:$0xff] }
 0x22f   : > { %v1563_v38 = vmul.f32 %v2365_v36, %v1547_v37  ;;  %1415 = vst.msk [vmem:[#allocation3 + $0x68] sm:$0xff] %vm1126_vm0, %v1398_v34  ;;  %v1391_v39 = vadd.f32 %v1361_v35, %v1149_v32 }
 0x231   : > { %1579 = vst.msk [vmem:[#allocation3 + $0x60] sm:$0xff] %vm1126_vm0, %v1563_v38  ;;  %v1540_v44 = vld [vmem:[#allocation3 + $0x28] sm:$0xff]  ;;  %v1331_v45 = vpop.f32.mrf.mxu2 }
 0x232   : > { %v1556_v48 = vmul.f32 %v2358_v43, %v1540_v44  ;;  %1408 = vst.msk [vmem:[#allocation3 + $0x30] sm:$0xff] %vm1126_vm0, %v1391_v39  ;;  %v1380_v50 = vpop.f32.mrf.mxu3 }
 0x233   : > { %v1381_v12 = vadd.f32 %v1380_v50, %v1331_v45  ;;  %v1313_v51 = vpop.f32.mrf.mxu0 }
 0x234   : > { %1572 = vst.msk [vmem:[#allocation3 + $0x28] sm:$0xff] %vm1126_vm0, %v1556_v48  ;;  %v1362_v41 = vpop.f32.mrf.mxu1 }
 0x235   : > { %v1399_v0 = vadd.f32 %v1381_v12, %v1157_v49  ;;  %v1363_v1 = vadd.f32 %v1362_v41, %v1313_v51 }
 0x236   : > { %v1548_v47 = vld [vmem:[#allocation3 + $0x68] sm:$0xff] }
 0x237   : > { %v1564_v53 = vmul.f32 %v2366_v54, %v1548_v47  ;;  %1416 = vst.msk [vmem:[#allocation3 + $0x70] sm:$0xff] %vm1126_vm0, %v1399_v0  ;;  %v1392_v58 = vadd.f32 %v1363_v1, %v1150_v40 }
 0x239   : > { %1580 = vst.msk [vmem:[#allocation3 + $0x68] sm:$0xff] %vm1126_vm0, %v1564_v53  ;;  %v1541_v7 = vld [vmem:[#allocation3 + $0x30] sm:$0xff]  ;;  %v1333_v13 = vpop.f32.mrf.mxu2 }
 0x23a   : > { %v1557_v19 = vmul.f32 %v2359_v6, %v1541_v7  ;;  %1409 = vst.msk [vmem:[#allocation3 + $0x38] sm:$0xff] %vm1126_vm0, %v1392_v58  ;;  %v1382_v56 = vpop.f32.mrf.mxu3 }
 0x23b   : > { %v1383_v8 = vadd.f32 %v1382_v56, %v1333_v13 }
 0x23c   : > { %1573 = vst.msk [vmem:[#allocation3 + $0x30] sm:$0xff] %vm1126_vm0, %v1557_v19 }
 0x23d   : > { %v1400_v57 = vadd.f32 %v1383_v8, %v1158_v55 }
 0x23e   : > { %v1549_v62 = vld [vmem:[#allocation3 + $0x70] sm:$0xff] }
 0x23f   : > { %v1565_v63 = vmul.f32 %v2367_v61, %v1549_v62  ;;  %1417 = vst.msk [vmem:[#allocation3 + $0x78] sm:$0xff] %vm1126_vm0, %v1400_v57 }
 0x241   : > { %1581 = vst.msk [vmem:[#allocation3 + $0x70] sm:$0xff] %vm1126_vm0, %v1565_v63  ;;  %v1542_v3 = vld [vmem:[#allocation3 + $0x38] sm:$0xff] }
 0x242   : > { %v1558_v4 = vmul.f32 %v2360_v60, %v1542_v3 }
 0x244   : > { %1574 = vst.msk [vmem:[#allocation3 + $0x38] sm:$0xff] %vm1126_vm0, %v1558_v4 }
 0x246   : > { %v1550_v25 = vld [vmem:[#allocation3 + $0x78] sm:$0xff] }
 0x247   : > { %v1566_v9 = vmul.f32 %v2368_v5, %v1550_v25 }
 0x249   : > { %1582 = vst.msk [vmem:[#allocation3 + $0x78] sm:$0xff] %vm1126_vm0, %v1566_v9 }
 0x24a PF: > { %v2379_v10 = vld [vmem:[%s3137_s9 + $0x10] sm:$0xf]  ;;  %v2478_v11 = vld [vmem:[%s3137_s9 + $0x14] sm:$0xf0]  ;;  %v2477_v18 = vld [vmem:[%s3137_s9 + $0x14] sm:$0xf] }
 0x24b   : > { %v2380_v14 = vor.u32 %v2478_v11, %v2379_v10  ;;  %v2381_v15 = vld [vmem:[%s3137_s9 + $0x18] sm:$0xf0]  ;;  %v2371_v16 = vld [vmem:[%s3137_s9] sm:$0xf]  ;;  %v2476_v46 = vld [vmem:[%s3137_s9 + $0x4] sm:$0xf0] }
 0x24c   : > { %v2384_v17 = vor.u32 %v2477_v18, %v2381_v15  ;;  %v2475_v20 = vld [vmem:[%s3137_s9 + $0x4] sm:$0xf]  ;;  %v2373_v21 = vld [vmem:[%s3137_s9 + $0x8] sm:$0xf0]  ;;  %v2372_v23 = vor.u32 %v2476_v46, %v2371_v16  ;;  %vm1704_vm0 = vcmask 261120   ;;  %v1658_v52 = vld [vmem:[#allocation3 + $0x10] sm:$0xff] }
 0x24d   : > { %v1656_v22 = vld [vmem:[#allocation3] sm:$0xff]  ;;  %1735 = vmatpush.bf16.msra.mxu0 %v2380_v14  ;;  %2496 = vmatpush.bf16.msra.mxu2 %v2380_v14  ;;  %v1657_v24 = vld [vmem:[#allocation3 + $0x8] sm:$0xff]  ;;  %v2376_v28 = vor.u32 %v2475_v20, %v2373_v21  ;;  %v1659_v31 = vld [vmem:[#allocation3 + $0x18] sm:$0xff]  ;;  %s2479_s20 = sshll.u32 %s2748_s8, 6  ;;  %s1907_s17 = sshll.u32 %s3140_s16, 4  ;;  %s1908_s17 = int_to_ptr.vmem [resolvable:$true] %s1907_s17 }
 0x24e   : > { %v1664_v26 = vld [vmem:[#allocation3 + $0x40] sm:$0xff]  ;;  %v1665_v27 = vld [vmem:[#allocation3 + $0x48] sm:$0xff]  ;;  %1784 = vmatpush.bf16.msra.mxu1 %v2384_v17  ;;  %2498 = vmatpush.bf16.msra.mxu3 %v2384_v17  ;;  %v1672_v29 = vpack.c.bf16 %v1657_v24, %v1656_v22  ;;  %v1666_v32 = vld [vmem:[#allocation3 + $0x50] sm:$0xff]  ;;  %v1673_v34 = vpack.c.bf16 %v1659_v31, %v1658_v52  ;;  %s1892_s13 = scalar_lea.sflag [#allocation6], %s465_s14  ;;  %s2658_s15 = scalar_lea.hbm %s3501_s7, 1024 }
 0x24f   : > { %v1676_v30 = vpack.c.bf16 %v1665_v27, %v1664_v26  ;;  %v1667_v33 = vld [vmem:[#allocation3 + $0x58] sm:$0xff]  ;;  %v1660_v36 = vld [vmem:[#allocation3 + $0x20] sm:$0xff]  ;;  %v1661_v37 = vld [vmem:[#allocation3 + $0x28] sm:$0xff] }
 0x250   : > { %v1677_v35 = vpack.c.bf16 %v1667_v33, %v1666_v32  ;;  %v1668_v38 = vld [vmem:[#allocation3 + $0x60] sm:$0xff]  ;;  %v1669_v39 = vld [vmem:[#allocation3 + $0x68] sm:$0xff]  ;;  %v1674_v42 = vpack.c.bf16 %v1661_v37, %v1660_v36  ;;  %v1662_v44 = vld [vmem:[#allocation3 + $0x30] sm:$0xff] }
 0x251   : > { %1736 = vmatpush.bf16.msra.mxu0 %v2372_v23  ;;  %2497 = vmatpush.bf16.msra.mxu2 %v2372_v23  ;;  %v1678_v43 = vpack.c.bf16 %v1669_v39, %v1668_v38  ;;  %v1663_v45 = vld [vmem:[#allocation3 + $0x38] sm:$0xff]  ;;  %v1670_v48 = vld [vmem:[#allocation3 + $0x70] sm:$0xff]  ;;  %v1618_v51 = vld [vmem:[%s491_s12] sm:$0x3]  ;;  %s1904_s12 = sadd.s32 %s2479_s20, %s2941_s19 }
 0x252   : > { %1785 = vmatpush.bf16.msra.mxu1 %v2376_v28  ;;  %2499 = vmatpush.bf16.msra.mxu3 %v2376_v28  ;;  %v1671_v49 = vld [vmem:[#allocation3 + $0x78] sm:$0xff]  ;;  %v1675_v50 = vpack.c.bf16 %v1663_v45, %v1662_v44  ;;  %v3371_v40 = vperm.slane %v1618_v51, 0  ;;  %v1586_v41 = vld [vmem:[#allocation2 + $0xb0] sm:$0xff]  ;;  %v3373_v0 = vperm.slane %v1618_v51, 1  ;;  %v1587_v1 = vld [vmem:[#allocation2] sm:$0xff]  ;;  %s2405_s8 = sshll.u32 %s1904_s12, 3 }
 0x253   : > { %v1679_v12 = vpack.c.bf16 %v1671_v49, %v1670_v48  ;;  %v1602_v58 = vld [vmem:[#allocation2 + $0x38] sm:$0xff]  ;;  %v1604_v4 = vld [vmem:[#allocation2 + $0x40] sm:$0xff]  ;;  %v1605_v9 = vld [vmem:[#allocation2 + $0xc8] sm:$0xff]  ;;  %s1906_s27 = scalar_lea.hbm %s3501_s7, %s2405_s8 }
 0x254   : > { %2385 = vmatmul.msk.bf16.vlgmr.msra.gmra.mxu0 %vm1704_vm0, %v1672_v29  ;;  %2389 = vmatmul.msk.bf16.vlgmr.msra.gmra.mxu2 %vm1704_vm0, %v1676_v30  ;;  %v1624_v54 = vadd.f32 %v3371_v40, %v1586_v41  ;;  %v1625_v47 = vadd.f32 %v3373_v0, %v1587_v1  ;;  %v1603_v7 = vld [vmem:[#allocation2 + $0x58] sm:$0xff]  ;;  %v1640_v55 = vadd.f32 %v3371_v40, %v1602_v58  ;;  %v1590_v11 = vld [vmem:[#allocation2 + $0x50] sm:$0xff]  ;;  %v1591_v14 = vld [vmem:[#allocation2 + $0x68] sm:$0xff]  ;;  %s1909_s23 = sshll.u32 %s1906_s27, 4  ;;  %s1910_s23 = int_to_ptr.hbm [resolvable:$true] %s1909_s23 }
 0x255   : > { %2393 = vmatmul.msk.bf16.vlgmr.msra.gmra.mxu1 %vm1704_vm0, %v1672_v29  ;;  %2397 = vmatmul.msk.bf16.vlgmr.msra.gmra.mxu3 %vm1704_vm0, %v1676_v30  ;;  %v1588_v19 = vld [vmem:[#allocation2 + $0xd8] sm:$0xff]  ;;  %v1641_v8 = vadd.f32 %v3373_v0, %v1603_v7  ;;  %v1642_v18 = vadd.f32 %v3371_v40, %v1604_v4  ;;  %v1643_v15 = vadd.f32 %v3373_v0, %v1605_v9  ;;  %v1606_v24 = vld [vmem:[#allocation2 + $0xe0] sm:$0xff]  ;;  %v1607_v28 = vld [vmem:[#allocation2 + $0x90] sm:$0xff]  ;;  %s2652_s22 = sshra.s32 %s1910_s23, 4  ;;  %s2653_s22 = int_to_ptr.hbm [resolvable:$true] %s2652_s22 }
 0x256   : > { %v1589_v56 = vld [vmem:[#allocation2 + $0x18] sm:$0xff]  ;;  %v1626_v57 = vadd.f32 %v3371_v40, %v1588_v19  ;;  %v1628_v16 = vadd.f32 %v3371_v40, %v1590_v11  ;;  %v1629_v17 = vadd.f32 %v3373_v0, %v1591_v14  ;;  %v1592_v30 = vld [vmem:[#allocation2 + $0x30] sm:$0xff]  ;;  %v1644_v52 = vadd.f32 %v3371_v40, %v1606_v24  ;;  %v1593_v31 = vld [vmem:[#allocation2 + $0x48] sm:$0xff]  ;;  %s2654_s24 = scalar_lea.hbm %s2653_s22, 256  ;;  %p2659_p12 = scmp.lt.s32.totalorder %s2653_s22, %s3501_s7 }
 0x257   : > { %v1627_v62 = vadd.f32 %v3373_v0, %v1589_v56  ;;  %v1645_v32 = vadd.f32 %v3373_v0, %v1607_v28  ;;  %v1630_v33 = vadd.f32 %v3371_v40, %v1592_v30  ;;  %v1609_v45 = vld [vmem:[#allocation2 + $0xc0] sm:$0xff]  ;;  %v1611_v19 = vld [vmem:[#allocation2 + $0xd0] sm:$0xff]  ;;  %v1596_v56 = vld [vmem:[#allocation2 + $0xe8] sm:$0xff]  ;;  %p2655_p9 = scmp.ne.s32.totalorder %s2653_s22, %s2654_s24  ;;  %p2660_p0 = scmp.lt.s32.totalorder %s2658_s15, %s2654_s24 }
 0x258   : > { %v1594_v49 = vld [vmem:[#allocation2 + $0x80] sm:$0xff]  ;;  %v1647_v51 = vadd.f32 %v3373_v0, %v1609_v45  ;;  %v1613_v11 = vld [vmem:[#allocation2 + $0x28] sm:$0xff]  ;;  %v1615_v30 = vld [vmem:[#allocation2 + $0xf8] sm:$0xff] }
 0x259   : > { %v1632_v41 = vadd.f32 %v3371_v40, %v1594_v49  ;;  %v1598_v14 = vld [vmem:[#allocation2 + $0x60] sm:$0xff]  ;;  %v1617_v49 = vld [vmem:[#allocation2 + $0x98] sm:$0xff]  ;;  %p2656_p10 = pnand %p2655_p9, %p2900_p13  ;;  %p2661_p2 = por %p2660_p0, %p2659_p12 }
 0x25b   : > { %p2657_p11 = pneg %p2656_p10 }
 0x25d   : > { %p2662_p4 = pnand %p2661_p2, %p2657_p11 }
 0x264   : > { %2386 = vmatmul.msk.bf16.gmra.mxu0 %vm1704_vm0, %v1673_v34  ;;  %2390 = vmatmul.msk.bf16.gmra.mxu2 %vm1704_vm0, %v1677_v35 }
 0x265   : > { %2394 = vmatmul.msk.bf16.gmra.mxu1 %vm1704_vm0, %v1673_v34  ;;  %2398 = vmatmul.msk.bf16.gmra.mxu3 %vm1704_vm0, %v1677_v35  ;;  %v1631_v35 = vadd.f32 %v3373_v0, %v1593_v31  ;;  %v1600_v31 = vld [vmem:[#allocation2 + $0x8] sm:$0xff] }
 0x274   : > { %2387 = vmatmul.msk.bf16.gmra.mxu0 %vm1704_vm0, %v1674_v42  ;;  %2391 = vmatmul.msk.bf16.gmra.mxu2 %vm1704_vm0, %v1678_v43 }
 0x275   : > { %2395 = vmatmul.msk.bf16.gmra.mxu1 %vm1704_vm0, %v1674_v42  ;;  %2399 = vmatmul.msk.bf16.gmra.mxu3 %vm1704_vm0, %v1678_v43  ;;  %v1608_v42 = vld [vmem:[#allocation2 + $0x70] sm:$0xff] }
 0x284   : > { %2388 = vmatmul.msk.bf16.gmra.mxu0 %vm1704_vm0, %v1675_v50  ;;  %2392 = vmatmul.msk.bf16.gmra.mxu2 %vm1704_vm0, %v1679_v12 }
 0x285   : > { %2396 = vmatmul.msk.bf16.gmra.mxu1 %vm1704_vm0, %v1675_v50  ;;  %2400 = vmatmul.msk.bf16.gmra.mxu3 %vm1704_vm0, %v1679_v12  ;;  %v1646_v50 = vadd.f32 %v3371_v40, %v1608_v42  ;;  %v1595_v12 = vld [vmem:[#allocation2 + $0x88] sm:$0xff] }
 0x2d1   : > { %v1738_v53 = vpop.f32.mrf.mxu0 }
 0x2d2   : > { %v1827_v59 = vadd.f32 %v1738_v53, %v1624_v54  ;;  %v1787_v6 = vpop.f32.mrf.mxu1  ;;  %v1633_v54 = vadd.f32 %v3373_v0, %v1595_v12 }
 0x2d3   : > { %v1828_v13 = vadd.f32 %v1787_v6, %v1625_v47  ;;  %v1610_v6 = vld [vmem:[#allocation2 + $0xa8] sm:$0xff] }
 0x2d4   : > { %1859 = vst [vmem:[%s3140_s16] sm:$0xff] %v1827_v59 }
 0x2d5   : > { %1860 = vst [vmem:[%s3140_s16 + $0x8] sm:$0xff] %v1828_v13 }
 0x2d7   : > { %v1758_v61 = vpop.f32.mrf.mxu2 }
 0x2d8   : > { %v1843_v63 = vadd.f32 %v1758_v61, %v1640_v55  ;;  %v1807_v2 = vpop.f32.mrf.mxu3  ;;  %v1649_v61 = vadd.f32 %v3373_v0, %v1611_v19 }
 0x2d9   : > { %v1844_v60 = vadd.f32 %v1807_v2, %v1641_v8  ;;  %v1740_v3 = vpop.f32.mrf.mxu0  ;;  %v1648_v8 = vadd.f32 %v3371_v40, %v1610_v6 }
 0x2da   : > { %1875 = vst [vmem:[%s3140_s16 + $0x80] sm:$0xff] %v1843_v63  ;;  %v1829_v5 = vadd.f32 %v1740_v3, %v1626_v57  ;;  %v1789_v25 = vpop.f32.mrf.mxu1  ;;  %v1597_v57 = vld [vmem:[#allocation2 + $0xb8] sm:$0xff] }
 0x2db   : > { %1876 = vst [vmem:[%s3140_s16 + $0x88] sm:$0xff] %v1844_v60  ;;  %v1830_v10 = vadd.f32 %v1789_v25, %v1627_v62  ;;  %v1634_v62 = vadd.f32 %v3371_v40, %v1596_v56  ;;  %v1635_v2 = vadd.f32 %v3373_v0, %v1597_v57  ;;  %v1612_v25 = vld [vmem:[#allocation2 + $0x10] sm:$0xff] }
 0x2dc   : > { %1861 = vst [vmem:[%s3140_s16 + $0x10] sm:$0xff] %v1829_v5 }
 0x2dd   : > { %1862 = vst [vmem:[%s3140_s16 + $0x18] sm:$0xff] %v1830_v10 }
 0x2df   : > { %v1760_v46 = vpop.f32.mrf.mxu2 }
 0x2e0   : > { %v1845_v20 = vadd.f32 %v1760_v46, %v1642_v18  ;;  %v1809_v21 = vpop.f32.mrf.mxu3  ;;  %v1651_v46 = vadd.f32 %v3373_v0, %v1613_v11 }
 0x2e1   : > { %v1846_v22 = vadd.f32 %v1809_v21, %v1643_v15  ;;  %v1743_v23 = vpop.f32.mrf.mxu0  ;;  %v1650_v15 = vadd.f32 %v3371_v40, %v1612_v25 }
 0x2e2   : > { %1877 = vst [vmem:[%s3140_s16 + $0x90] sm:$0xff] %v1845_v20  ;;  %v1831_v26 = vadd.f32 %v1743_v23, %v1628_v16  ;;  %v1792_v27 = vpop.f32.mrf.mxu1  ;;  %v1599_v16 = vld [vmem:[#allocation2 + $0xf0] sm:$0xff] }
 0x2e3   : > { %1878 = vst [vmem:[%s3140_s16 + $0x98] sm:$0xff] %v1846_v22  ;;  %v1832_v29 = vadd.f32 %v1792_v27, %v1629_v17  ;;  %v1636_v17 = vadd.f32 %v3371_v40, %v1598_v14  ;;  %v1637_v21 = vadd.f32 %v3373_v0, %v1599_v16  ;;  %v1614_v27 = vld [vmem:[#allocation2 + $0xa0] sm:$0xff] }
 0x2e4   : > { %1863 = vst [vmem:[%s3140_s16 + $0x20] sm:$0xff] %v1831_v26 }
 0x2e5   : > { %1864 = vst [vmem:[%s3140_s16 + $0x28] sm:$0xff] %v1832_v29 }
 0x2e7   : > { %v1763_v34 = vpop.f32.mrf.mxu2 }
 0x2e8   : > { %v1847_v36 = vadd.f32 %v1763_v34, %v1644_v52  ;;  %v1812_v37 = vpop.f32.mrf.mxu3  ;;  %v1653_v34 = vadd.f32 %v3373_v0, %v1615_v30 }
 0x2e9   : > { %v1848_v38 = vadd.f32 %v1812_v37, %v1645_v32  ;;  %v1745_v39 = vpop.f32.mrf.mxu0  ;;  %v1652_v32 = vadd.f32 %v3371_v40, %v1614_v27 }
 0x2ea   : > { %1879 = vst [vmem:[%s3140_s16 + $0xa0] sm:$0xff] %v1847_v36  ;;  %v1833_v43 = vadd.f32 %v1745_v39, %v1630_v33  ;;  %v1794_v44 = vpop.f32.mrf.mxu1  ;;  %v1601_v33 = vld [vmem:[#allocation2 + $0x78] sm:$0xff] }
 0x2eb   : > { %1880 = vst [vmem:[%s3140_s16 + $0xa8] sm:$0xff] %v1848_v38  ;;  %v1834_v48 = vadd.f32 %v1794_v44, %v1631_v35  ;;  %v1638_v35 = vadd.f32 %v3371_v40, %v1600_v31  ;;  %v1639_v37 = vadd.f32 %v3373_v0, %v1601_v33  ;;  %v1616_v44 = vld [vmem:[#allocation2 + $0x20] sm:$0xff] }
 0x2ec   : > { %1865 = vst [vmem:[%s3140_s16 + $0x30] sm:$0xff] %v1833_v43  ;;  %v1654_v12 = vadd.f32 %v3371_v40, %v1616_v44 }
 0x2ed   : > { %1866 = vst [vmem:[%s3140_s16 + $0x38] sm:$0xff] %v1834_v48 }
 0x2ef   : > { %v1765_v1 = vpop.f32.mrf.mxu2 }
 0x2f0   : > { %v1849_v47 = vadd.f32 %v1765_v1, %v1646_v50  ;;  %v1814_v53 = vpop.f32.mrf.mxu3 }
 0x2f1   : > { %v1850_v58 = vadd.f32 %v1814_v53, %v1647_v51  ;;  %v1748_v59 = vpop.f32.mrf.mxu0  ;;  %v1655_v51 = vadd.f32 %v3373_v0, %v1617_v49 }
 0x2f2   : > { %1881 = vst [vmem:[%s3140_s16 + $0xb0] sm:$0xff] %v1849_v47  ;;  %v1835_v7 = vadd.f32 %v1748_v59, %v1632_v41  ;;  %v1797_v13 = vpop.f32.mrf.mxu1 }
 0x2f3   : > { %1882 = vst [vmem:[%s3140_s16 + $0xb8] sm:$0xff] %v1850_v58  ;;  %v1836_v55 = vadd.f32 %v1797_v13, %v1633_v54 }
 0x2f4   : > { %1867 = vst [vmem:[%s3140_s16 + $0x40] sm:$0xff] %v1835_v7 }
 0x2f5   : > { %1868 = vst [vmem:[%s3140_s16 + $0x48] sm:$0xff] %v1836_v55 }
 0x2f7   : > { %v1768_v63 = vpop.f32.mrf.mxu2 }
 0x2f8   : > { %v1851_v60 = vadd.f32 %v1768_v63, %v1648_v8  ;;  %v1817_v3 = vpop.f32.mrf.mxu3 }
 0x2f9   : > { %v1852_v4 = vadd.f32 %v1817_v3, %v1649_v61  ;;  %v1750_v5 = vpop.f32.mrf.mxu0 }
 0x2fa   : > { %1883 = vst [vmem:[%s3140_s16 + $0xc0] sm:$0xff] %v1851_v60  ;;  %v1837_v9 = vadd.f32 %v1750_v5, %v1634_v62  ;;  %v1799_v10 = vpop.f32.mrf.mxu1 }
 0x2fb   : > { %1884 = vst [vmem:[%s3140_s16 + $0xc8] sm:$0xff] %v1852_v4  ;;  %v1838_v18 = vadd.f32 %v1799_v10, %v1635_v2 }
 0x2fc   : > { %1869 = vst [vmem:[%s3140_s16 + $0x50] sm:$0xff] %v1837_v9 }
 0x2fd   : > { %1870 = vst [vmem:[%s3140_s16 + $0x58] sm:$0xff] %v1838_v18 }
 0x2ff   : > { %v1770_v20 = vpop.f32.mrf.mxu2 }
 0x300   : > { %v1853_v22 = vadd.f32 %v1770_v20, %v1650_v15  ;;  %v1819_v23 = vpop.f32.mrf.mxu3 }
 0x301   : > { %v1854_v24 = vadd.f32 %v1819_v23, %v1651_v46  ;;  %v1753_v26 = vpop.f32.mrf.mxu0 }
 0x302   : > { %1885 = vst [vmem:[%s3140_s16 + $0xd0] sm:$0xff] %v1853_v22  ;;  %v1839_v28 = vadd.f32 %v1753_v26, %v1636_v17  ;;  %v1802_v29 = vpop.f32.mrf.mxu1 }
 0x303   : > { %1886 = vst [vmem:[%s3140_s16 + $0xd8] sm:$0xff] %v1854_v24  ;;  %v1840_v52 = vadd.f32 %v1802_v29, %v1637_v21 }
 0x304   : > { %1871 = vst [vmem:[%s3140_s16 + $0x60] sm:$0xff] %v1839_v28 }
 0x305   : > { %1872 = vst [vmem:[%s3140_s16 + $0x68] sm:$0xff] %v1840_v52 }
 0x307   : > { %v1773_v36 = vpop.f32.mrf.mxu2 }
 0x308   : > { %v1855_v38 = vadd.f32 %v1773_v36, %v1652_v32  ;;  %v1822_v39 = vpop.f32.mrf.mxu3 }
 0x309   : > { %v1856_v42 = vadd.f32 %v1822_v39, %v1653_v34  ;;  %v1755_v43 = vpop.f32.mrf.mxu0 }
 0x30a   : > { %1887 = vst [vmem:[%s3140_s16 + $0xe0] sm:$0xff] %v1855_v38  ;;  %v1841_v45 = vadd.f32 %v1755_v43, %v1638_v35  ;;  %v1804_v48 = vpop.f32.mrf.mxu1 }
 0x30b   : > { %1888 = vst [vmem:[%s3140_s16 + $0xe8] sm:$0xff] %v1856_v42  ;;  %v1842_v50 = vadd.f32 %v1804_v48, %v1639_v37 }
 0x30c   : > { %1873 = vst [vmem:[%s3140_s16 + $0x70] sm:$0xff] %v1841_v45 }
 0x30d   : > { %1874 = vst [vmem:[%s3140_s16 + $0x78] sm:$0xff] %v1842_v50 }
 0x30f   : > { %v1775_v41 = vpop.f32.mrf.mxu2 }
 0x310   : > { %v1857_v1 = vadd.f32 %v1775_v41, %v1654_v12  ;;  %v1824_v54 = vpop.f32.mrf.mxu3 }
 0x311   : > { %v1858_v47 = vadd.f32 %v1824_v54, %v1655_v51 }
 0x312   : > { %1889 = vst [vmem:[%s3140_s16 + $0xf0] sm:$0xff] %v1857_v1 }
 0x313   : > { %1890 = vst [vmem:[%s3140_s16 + $0xf8] sm:$0xff] %v1858_v47 }
 0x314   : > { %2665 = shalt.err (!%p2662_p4)
}
 0x315   : > { %s2767_s14 = smov 256   ;;  %s2768_s16 = smov 512  }
 0x316   : > { %s2769_s26 = smov 16  }
 0x317   : > { %2502 = dma.vmem_to_hbm [thread:$0]  (%p2900_p13), %s1908_s17, 4096, %s1910_s23, %s1892_s13, %s2767_s14, %s2768_s16, %s2769_s26  }
 0x318 PF: > { %s3529_s20 = sld [smem:[#allocation11_spill]]  ;;  %p2508_p3 = scmp.ge.s32.totalorder %s2760_s11, 2 }
 0x31a   : > { %p2505_p5 = pnand %p2508_p3, %p2904_p1 }
 0x31c   : > { %p2506_p6 = pneg %p2505_p5 }
 0x31e   : > { %s1924_s8 = sand.u32 1, %s3529_s20  }
 0x31f   : > { %s1925_s19 = scalar_lea.sflag [#allocation6], %s1924_s8 }
 0x320   : > { %2715 = dma.done.wait (%p2506_p6), %s1925_s19, 4096  }
 0x321   : > { %2717 = vsyncadd (%p2506_p6), %s1925_s19, 4294963200  ;;  %s23_s11 = sadd.s32 1, %s2760_s11   ;;  %s3531_s29 = sld [smem:[#allocation12_spill]] }
 0x322   : > { %p20_p7 = scmp.ge.s32.totalorder %s23_s11, 6   ;;  %s3532_s26 = sld [smem:[#allocation19_spill]] }
 0x323   : > { %s3533_s17 = sld [smem:[#allocation13_spill]]  ;;  %s3539_s24 = smov %s2724_s25 }
 0x324   : > { %s3534_s21 = sld [smem:[#allocation18_spill]]  ;;  %s3541_s27 = smov %s2736_s28 }
 0x325   : > { %s3535_s30 = sld [smem:[#allocation14_spill]] }
 0x326   : > { %s3536_s8 = sld [smem:[#allocation15_spill]]  ;;  %22 = sbr.rel (!%p20_p7) target bundleno = 9 (0x9), region = 171 }
 0x327   : > { %s3537_s9 = sld [smem:[#allocation16_spill]]  ;;  %s3540_s25 = smov %s3531_s29 }
 0x328   : > { %s3538_s10 = sld [smem:[#allocation17_spill]] }
 0x329   : > { %s3542_s28 = smov %s3533_s17 }
 0x32a   : > { %s3543_s29 = smov %s3534_s21 }
 0x32b   :  { %1931 = vsyncpa [#allocation5], 1 }
 0x32c   :  { %1933 = vsyncpa [#allocation5 + $0x1], 1 }
 0x32d   :  { %1934 = vsyncpa [#allocation6], 1 }
 0x32e   :  { %1936 = vsyncpa [#allocation6 + $0x1], 1 }

</bundles_post_ra>
